<compile_context>
chip_gen: v5e
topology: v5e:2x2
jax: 0.10.0
libtpu: 0.0.40
codegen_flags: <defaults>
</compile_context>

<pallas_src>
import functools

import jax
import jax.numpy as jnp
from jax.experimental import pallas as pl
from jax.experimental.pallas import tpu as pltpu


def mlp_kernel(x_ref,
               w1_ref, b1_ref,
               w2_ref, b2_ref,
               w3_ref, b3_ref,
               w4_ref, b4_ref,
               w5_ref, b5_ref,
               o_ref):
    """Fused 5-layer MLP forward for one (TB, 784) batch tile.

    bf16 x bf16 matmuls on the MXU with f32 accumulation; bias add + ReLU on
    the VPU in f32; intermediate activations recast to bf16 for the next
    matmul.  All hidden widths are multiples of 128 (layer 4 zero-padded).
    """
    h = x_ref[...]  # (TB, 784) bf16
    for w_ref, b_ref in ((w1_ref, b1_ref), (w2_ref, b2_ref),
                         (w3_ref, b3_ref), (w4_ref, b4_ref)):
        acc = jnp.dot(h, w_ref[...], preferred_element_type=jnp.float32)
        h = jnp.maximum(acc + b_ref[...], 0.0).astype(jnp.bfloat16)
    # Final layer: output padded to 128 lanes (lane-dense store), no ReLU.
    o_ref[...] = (jnp.dot(h, w5_ref[...], preferred_element_type=jnp.float32)
                  + b5_ref[...])


def prepare_params(params, *, out_pad=128, hid_pad=128):
    """One-time param prep: pad 64-wide layer + final layer to 128 lanes and
    cast weights to bf16 / biases to f32.  Do NOT re-run per forward call."""
    prepped = []
    n = len(params)
    for li, (w, b) in enumerate(params):
        w = jnp.asarray(w, jnp.float32)
        b = jnp.asarray(b, jnp.float32)
        if li == n - 2:
            # 128 -> 64 layer: pad output width 64 -> 128 (ReLU(0+0)=0, exact).
            w = jnp.pad(w, ((0, 0), (0, hid_pad - w.shape[1])))
            b = jnp.pad(b, ((0, 0), (0, hid_pad - b.shape[1])))
        elif li == n - 1:
            # 64 -> 10 layer: pad rows 64 -> 128 (zero rows contribute nothing)
            # and output lanes 10 -> 128 (lane-dense final store).
            w = jnp.pad(w, ((0, hid_pad - w.shape[0]), (0, out_pad - w.shape[1])))
            b = jnp.pad(b, ((0, 0), (0, out_pad - b.shape[1])))
        prepped.append((w.astype(jnp.bfloat16), b.astype(jnp.float32)))
    return prepped


def mlp_forward(x, prepped_params, *, tb=256):
    """x: (B, 1, 28, 28) or (B, 784). prepped_params: output of prepare_params.

    tb: batch tile.  256 fills the 256-wide MXU on v6e/v7x (128 already fills
    v5e's); clamped down for tiny batches so we do not overpad.
    """
    x2d = x.reshape(-1, 784).astype(jnp.float32)   # matches torch .view(-1, 784)
    B = x2d.shape[0]

    # Tile selection: multiple of 8 sublanes, no larger than the (rounded) batch.
    tb_eff = min(tb, max(8, pl.cdiv(B, 8) * 8))
    tb_eff = max(8, (tb_eff // 8) * 8)

    Bp = pl.cdiv(B, tb_eff) * tb_eff
    if Bp != B:
        x2d = jnp.pad(x2d, ((0, Bp - B), (0, 0)))  # zero-pad batch to tile multiple
    x_bf = x2d.astype(jnp.bfloat16)

    out_pad = prepped_params[-1][0].shape[1]  # 128; real logits live in [:, :10]

    flat_args = [x_bf]
    in_specs = [pl.BlockSpec((tb_eff, 784), lambda i: (i, 0))]
    for w, b in prepped_params:
        flat_args += [w, b]
        # Full-extent blocks with constant index_map: weights/biases stay
        # VMEM-resident across all batch-grid steps (loaded once).
        in_specs += [pl.BlockSpec(w.shape, lambda i: (0, 0)),
                     pl.BlockSpec(b.shape, lambda i: (0, 0))]

    out = pl.pallas_call(
        mlp_kernel,
        out_shape=jax.ShapeDtypeStruct((Bp, out_pad), jnp.float32),
        grid=(Bp // tb_eff,),
        in_specs=in_specs,
        out_specs=pl.BlockSpec((tb_eff, out_pad), lambda i: (i, 0)),
        compiler_params=pltpu.CompilerParams(
            dimension_semantics=("parallel",)),
    )(*flat_args)
    return out[:B, :10]


def init_params(key):
    """Deterministic init matching nn.Linear shapes (weight stored transposed)."""
    dims = [784, 512, 256, 128, 64, 10]
    params = []
    for i in range(len(dims) - 1):
        fan_in, fan_out = dims[i], dims[i + 1]
        key, kw, kb = jax.random.split(key, 3)
        bound = 1.0 / jnp.sqrt(fan_in)
        # PyTorch stores (out, in); we keep (in, out) so the kernel does x @ W.
        w = jax.random.uniform(kw, (fan_in, fan_out), jnp.float32, -bound, bound)
        b = jax.random.uniform(kb, (1, fan_out), jnp.float32, -bound, bound)
        params.append((w, b))
    return params


def reference_forward(x, params):
    """Pure-f32 reference matching the PyTorch module semantics."""
    h = x.reshape(-1, 784).astype(jnp.float32)
    for i, (w, b) in enumerate(params):
        h = h @ w + b
        if i < len(params) - 1:
            h = jnp.maximum(h, 0.0)
    return h


if __name__ == "__main__":
    key = jax.random.PRNGKey(0)
    kp, kx1, kx2 = jax.random.split(key, 3)
    params = init_params(kp)
    prepped = prepare_params(params)            # one-time weight cast/pad

    fwd = jax.jit(functools.partial(mlp_forward, tb=256))

    # Test 1: tiny MNIST-like batch (single grid step), NCHW input.
    x1 = jax.random.normal(kx1, (8, 1, 28, 28), jnp.float32)
    out1 = jax.block_until_ready(fwd(x1, prepped))
    ref1 = reference_forward(x1, params)
    assert out1.shape == (8, 10)
    # bf16 weights/activations -> loosened tolerance vs the f32 reference.
    assert jnp.allclose(out1, ref1, atol=5e-2, rtol=5e-2)

    # Test 2: multi-tile grid + non-multiple-of-tile batch (padding / slicing /
    # megacore-parallel path).  B=300 -> Bp=512, grid=(2,).
    x2 = jax.random.normal(kx2, (300, 784), jnp.float32)
    out2 = jax.block_until_ready(fwd(x2, prepped))
    ref2 = reference_forward(x2, params)
    assert out2.shape == (300, 10)
    assert jnp.allclose(out2, ref2, atol=1e-1, rtol=1e-1)

    print("KERNEL_OK")
</pallas_src>

<mosaic_0001>
module attributes {stable_mosaic.version = 11 : i64} {
  func.func @mlp_kernel(%arg0: i32, %arg1: memref<8x784xbf16, #tpu.memory_space<vmem>>, %arg2: memref<784x512xbf16, #tpu.memory_space<vmem>>, %arg3: memref<1x512xf32, #tpu.memory_space<vmem>>, %arg4: memref<512x256xbf16, #tpu.memory_space<vmem>>, %arg5: memref<1x256xf32, #tpu.memory_space<vmem>>, %arg6: memref<256x128xbf16, #tpu.memory_space<vmem>>, %arg7: memref<1x128xf32, #tpu.memory_space<vmem>>, %arg8: memref<128x128xbf16, #tpu.memory_space<vmem>>, %arg9: memref<1x128xf32, #tpu.memory_space<vmem>>, %arg10: memref<128x128xbf16, #tpu.memory_space<vmem>>, %arg11: memref<1x128xf32, #tpu.memory_space<vmem>>, %arg12: memref<8x128xf32, #tpu.memory_space<vmem>>) attributes {dimension_semantics = [#tpu.dimension_semantics<parallel>], iteration_bounds = array<i64: 1>, scalar_prefetch = 0 : i64, scratch_operands = 0 : i64, tpu.core_type = #tpu.core_type<tc>, window_params = [{transform_indices = @transform_0, window_bounds = array<i64: 8, 784>}, {pipeline_mode = #tpu.pipeline_mode<synchronous>, transform_indices = @transform_1, window_bounds = array<i64: 784, 512>}, {pipeline_mode = #tpu.pipeline_mode<synchronous>, transform_indices = @transform_2, window_bounds = array<i64: 1, 512>}, {pipeline_mode = #tpu.pipeline_mode<synchronous>, transform_indices = @transform_3, window_bounds = array<i64: 512, 256>}, {pipeline_mode = #tpu.pipeline_mode<synchronous>, transform_indices = @transform_4, window_bounds = array<i64: 1, 256>}, {pipeline_mode = #tpu.pipeline_mode<synchronous>, transform_indices = @transform_5, window_bounds = array<i64: 256, 128>}, {pipeline_mode = #tpu.pipeline_mode<synchronous>, transform_indices = @transform_6, window_bounds = array<i64: 1, 128>}, {pipeline_mode = #tpu.pipeline_mode<synchronous>, transform_indices = @transform_7, window_bounds = array<i64: 128, 128>}, {pipeline_mode = #tpu.pipeline_mode<synchronous>, transform_indices = @transform_8, window_bounds = array<i64: 1, 128>}, {pipeline_mode = #tpu.pipeline_mode<synchronous>, transform_indices = @transform_9, window_bounds = array<i64: 128, 128>}, {pipeline_mode = #tpu.pipeline_mode<synchronous>, transform_indices = @transform_10, window_bounds = array<i64: 1, 128>}, {transform_indices = @transform_11, window_bounds = array<i64: 8, 128>}]} {
    %c0 = arith.constant 0 : index
    %c0_0 = arith.constant 0 : index
    %0 = vector.load %arg1[%c0, %c0_0] : memref<8x784xbf16, #tpu.memory_space<vmem>>, vector<8x784xbf16>
    %c0_1 = arith.constant 0 : index
    %c0_2 = arith.constant 0 : index
    %1 = vector.load %arg2[%c0_1, %c0_2] : memref<784x512xbf16, #tpu.memory_space<vmem>>, vector<784x512xbf16>
    %cst = arith.constant dense<0.000000e+00> : vector<8x512xf32>
    %2 = tpu.matmul %0, %1, %cst {dimension_numbers = #tpu.dot_dimension_numbers<[1], [0], [0], [1], [0, 0, 1, 1], [], []>} : vector<8x784xbf16>, vector<784x512xbf16>, vector<8x512xf32> -> vector<8x512xf32>
    %c0_3 = arith.constant 0 : index
    %c0_4 = arith.constant 0 : index
    %3 = vector.load %arg3[%c0_3, %c0_4] : memref<1x512xf32, #tpu.memory_space<vmem>>, vector<1x512xf32>
    %4 = vector.broadcast %3 : vector<1x512xf32> to vector<8x512xf32>
    %5 = arith.addf %2, %4 : vector<8x512xf32>
    %cst_5 = arith.constant 0.000000e+00 : f32
    %6 = vector.broadcast %cst_5 : f32 to vector<8x512xf32>
    %7 = arith.maximumf %5, %6 : vector<8x512xf32>
    %8 = arith.truncf %7 : vector<8x512xf32> to vector<8x512xbf16>
    %c0_6 = arith.constant 0 : index
    %c0_7 = arith.constant 0 : index
    %9 = vector.load %arg4[%c0_6, %c0_7] : memref<512x256xbf16, #tpu.memory_space<vmem>>, vector<512x256xbf16>
    %cst_8 = arith.constant dense<0.000000e+00> : vector<8x256xf32>
    %10 = tpu.matmul %8, %9, %cst_8 {dimension_numbers = #tpu.dot_dimension_numbers<[1], [0], [0], [1], [0, 0, 1, 1], [], []>} : vector<8x512xbf16>, vector<512x256xbf16>, vector<8x256xf32> -> vector<8x256xf32>
    %c0_9 = arith.constant 0 : index
    %c0_10 = arith.constant 0 : index
    %11 = vector.load %arg5[%c0_9, %c0_10] : memref<1x256xf32, #tpu.memory_space<vmem>>, vector<1x256xf32>
    %12 = vector.broadcast %11 : vector<1x256xf32> to vector<8x256xf32>
    %13 = arith.addf %10, %12 : vector<8x256xf32>
    %cst_11 = arith.constant 0.000000e+00 : f32
    %14 = vector.broadcast %cst_11 : f32 to vector<8x256xf32>
    %15 = arith.maximumf %13, %14 : vector<8x256xf32>
    %16 = arith.truncf %15 : vector<8x256xf32> to vector<8x256xbf16>
    %c0_12 = arith.constant 0 : index
    %c0_13 = arith.constant 0 : index
    %17 = vector.load %arg6[%c0_12, %c0_13] : memref<256x128xbf16, #tpu.memory_space<vmem>>, vector<256x128xbf16>
    %cst_14 = arith.constant dense<0.000000e+00> : vector<8x128xf32>
    %18 = tpu.matmul %16, %17, %cst_14 {dimension_numbers = #tpu.dot_dimension_numbers<[1], [0], [0], [1], [0, 0, 1, 1], [], []>} : vector<8x256xbf16>, vector<256x128xbf16>, vector<8x128xf32> -> vector<8x128xf32>
    %c0_15 = arith.constant 0 : index
    %c0_16 = arith.constant 0 : index
    %19 = vector.load %arg7[%c0_15, %c0_16] : memref<1x128xf32, #tpu.memory_space<vmem>>, vector<1x128xf32>
    %20 = vector.broadcast %19 : vector<1x128xf32> to vector<8x128xf32>
    %21 = arith.addf %18, %20 : vector<8x128xf32>
    %cst_17 = arith.constant 0.000000e+00 : f32
    %22 = vector.broadcast %cst_17 : f32 to vector<8x128xf32>
    %23 = arith.maximumf %21, %22 : vector<8x128xf32>
    %24 = arith.truncf %23 : vector<8x128xf32> to vector<8x128xbf16>
    %c0_18 = arith.constant 0 : index
    %c0_19 = arith.constant 0 : index
    %25 = vector.load %arg8[%c0_18, %c0_19] : memref<128x128xbf16, #tpu.memory_space<vmem>>, vector<128x128xbf16>
    %cst_20 = arith.constant dense<0.000000e+00> : vector<8x128xf32>
    %26 = tpu.matmul %24, %25, %cst_20 {dimension_numbers = #tpu.dot_dimension_numbers<[1], [0], [0], [1], [0, 0, 1, 1], [], []>} : vector<8x128xbf16>, vector<128x128xbf16>, vector<8x128xf32> -> vector<8x128xf32>
    %c0_21 = arith.constant 0 : index
    %c0_22 = arith.constant 0 : index
    %27 = vector.load %arg9[%c0_21, %c0_22] : memref<1x128xf32, #tpu.memory_space<vmem>>, vector<1x128xf32>
    %28 = vector.broadcast %27 : vector<1x128xf32> to vector<8x128xf32>
    %29 = arith.addf %26, %28 : vector<8x128xf32>
    %cst_23 = arith.constant 0.000000e+00 : f32
    %30 = vector.broadcast %cst_23 : f32 to vector<8x128xf32>
    %31 = arith.maximumf %29, %30 : vector<8x128xf32>
    %32 = arith.truncf %31 : vector<8x128xf32> to vector<8x128xbf16>
    %c0_24 = arith.constant 0 : index
    %c0_25 = arith.constant 0 : index
    %33 = vector.load %arg10[%c0_24, %c0_25] : memref<128x128xbf16, #tpu.memory_space<vmem>>, vector<128x128xbf16>
    %cst_26 = arith.constant dense<0.000000e+00> : vector<8x128xf32>
    %34 = tpu.matmul %32, %33, %cst_26 {dimension_numbers = #tpu.dot_dimension_numbers<[1], [0], [0], [1], [0, 0, 1, 1], [], []>} : vector<8x128xbf16>, vector<128x128xbf16>, vector<8x128xf32> -> vector<8x128xf32>
    %c0_27 = arith.constant 0 : index
    %c0_28 = arith.constant 0 : index
    %35 = vector.load %arg11[%c0_27, %c0_28] : memref<1x128xf32, #tpu.memory_space<vmem>>, vector<1x128xf32>
    %36 = vector.broadcast %35 : vector<1x128xf32> to vector<8x128xf32>
    %37 = arith.addf %34, %36 : vector<8x128xf32>
    %c0_29 = arith.constant 0 : index
    %c0_30 = arith.constant 0 : index
    %38 = vector.load %arg12[%c0_29, %c0_30] : memref<8x128xf32, #tpu.memory_space<vmem>>, vector<8x128xf32>
    tpu.vector_store %arg12[%c0_29, %c0_30], %37 {strides = array<i32>} : memref<8x128xf32, #tpu.memory_space<vmem>>, vector<8x128xf32>,
    return
  }
  func.func @transform_0(%arg0: i32) -> (i32, i32) {
    %c0_i32 = arith.constant 0 : i32
    %c0_i32_0 = arith.constant 0 : i32
    return %arg0, %c0_i32 : i32, i32
  }
  func.func @transform_1(%arg0: i32) -> (i32, i32) {
    %c0_i32 = arith.constant 0 : i32
    %c0_i32_0 = arith.constant 0 : i32
    %c0_i32_1 = arith.constant 0 : i32
    return %c0_i32, %c0_i32_0 : i32, i32
  }
  func.func @transform_2(%arg0: i32) -> (i32, i32) {
    %c0_i32 = arith.constant 0 : i32
    %c0_i32_0 = arith.constant 0 : i32
    %c0_i32_1 = arith.constant 0 : i32
    return %c0_i32, %c0_i32_0 : i32, i32
  }
  func.func @transform_3(%arg0: i32) -> (i32, i32) {
    %c0_i32 = arith.constant 0 : i32
    %c0_i32_0 = arith.constant 0 : i32
    %c0_i32_1 = arith.constant 0 : i32
    return %c0_i32, %c0_i32_0 : i32, i32
  }
  func.func @transform_4(%arg0: i32) -> (i32, i32) {
    %c0_i32 = arith.constant 0 : i32
    %c0_i32_0 = arith.constant 0 : i32
    %c0_i32_1 = arith.constant 0 : i32
    return %c0_i32, %c0_i32_0 : i32, i32
  }
  func.func @transform_5(%arg0: i32) -> (i32, i32) {
    %c0_i32 = arith.constant 0 : i32
    %c0_i32_0 = arith.constant 0 : i32
    %c0_i32_1 = arith.constant 0 : i32
    return %c0_i32, %c0_i32_0 : i32, i32
  }
  func.func @transform_6(%arg0: i32) -> (i32, i32) {
    %c0_i32 = arith.constant 0 : i32
    %c0_i32_0 = arith.constant 0 : i32
    %c0_i32_1 = arith.constant 0 : i32
    return %c0_i32, %c0_i32_0 : i32, i32
  }
  func.func @transform_7(%arg0: i32) -> (i32, i32) {
    %c0_i32 = arith.constant 0 : i32
    %c0_i32_0 = arith.constant 0 : i32
    %c0_i32_1 = arith.constant 0 : i32
    return %c0_i32, %c0_i32_0 : i32, i32
  }
  func.func @transform_8(%arg0: i32) -> (i32, i32) {
    %c0_i32 = arith.constant 0 : i32
    %c0_i32_0 = arith.constant 0 : i32
    %c0_i32_1 = arith.constant 0 : i32
    return %c0_i32, %c0_i32_0 : i32, i32
  }
  func.func @transform_9(%arg0: i32) -> (i32, i32) {
    %c0_i32 = arith.constant 0 : i32
    %c0_i32_0 = arith.constant 0 : i32
    %c0_i32_1 = arith.constant 0 : i32
    return %c0_i32, %c0_i32_0 : i32, i32
  }
  func.func @transform_10(%arg0: i32) -> (i32, i32) {
    %c0_i32 = arith.constant 0 : i32
    %c0_i32_0 = arith.constant 0 : i32
    %c0_i32_1 = arith.constant 0 : i32
    return %c0_i32, %c0_i32_0 : i32, i32
  }
  func.func @transform_11(%arg0: i32) -> (i32, i32) {
    %c0_i32 = arith.constant 0 : i32
    %c0_i32_0 = arith.constant 0 : i32
    return %arg0, %c0_i32 : i32, i32
  }
}

</mosaic_0001>

<bundles_post_ra>
// kernel: mlp_forward.1
= control target key start
LH: loop header
LB: loop body
LE: loop exit
PB: predicated region body
PF: predicated region fallthrough
CT: control target
= control target key end

     0   :  { %16 = vsyncpa [#allocation3], 0  ;;  %s4331_s0 = inlined_call_operand.vmem [shape: bf16[8,784], index: 0, kind: input, shape index: {}]   ;;  %s4332_s1 = inlined_call_operand.hbm [shape: bf16[784,512], index: 1, kind: input, shape index: {}]   ;;  %s4333_s2 = inlined_call_operand.vmem [shape: f32[1,512], index: 2, kind: input, shape index: {}]   ;;  %s4334_s3 = inlined_call_operand.hbm [shape: bf16[512,256], index: 3, kind: input, shape index: {}]   ;;  %s4335_s4 = inlined_call_operand.vmem [shape: f32[1,256], index: 4, kind: input, shape index: {}]   ;;  %s4336_s5 = inlined_call_operand.vmem [shape: bf16[256,128], index: 5, kind: input, shape index: {}]   ;;  %s4337_s6 = inlined_call_operand.vmem [shape: f32[1,128], index: 6, kind: input, shape index: {}]   ;;  %s4338_s7 = inlined_call_operand.vmem [shape: bf16[128,128], index: 7, kind: input, shape index: {}]   ;;  %s4339_s8 = inlined_call_operand.vmem [shape: f32[1,128], index: 8, kind: input, shape index: {}]   ;;  %s4340_s9 = inlined_call_operand.vmem [shape: bf16[128,128], index: 9, kind: input, shape index: {}]   ;;  %s4341_s10 = inlined_call_operand.vmem [shape: f32[1,128], index: 10, kind: input, shape index: {}]   ;;  %s4342_s11 = inlined_call_operand.hbm [shape: f32[8,128], index: 11, kind: output, shape index: {}]  }
   0x1   :  { %17 = vsyncpa [#allocation6], 0 }
   0x2   :  { %18 = vsyncpa [#allocation4], 0  ;;  %s25_s19 = sshll.u32 %s4332_s1, 4  ;;  %s4055_s20 = smov [#allocation2]   ;;  %s26_s19 = int_to_ptr.hbm [resolvable:$true] %s25_s19 }
   0x3   :  { %s27_s21 = sshll.u32 %s4055_s20, 4  ;;  %s40_s24 = sshll.u32 %s4334_s3, 4  ;;  %s28_s21 = int_to_ptr.vmem [resolvable:$true] %s27_s21  ;;  %s41_s24 = int_to_ptr.hbm [resolvable:$true] %s40_s24 }
   0x4   :  { %s4056_s25 = smov 256   ;;  %s4057_s26 = smov 16  }
   0x5   :  { %33 = dma.hbm_to_vmem [thread:$0]  %s26_s19, 25088, %s28_s21, [#allocation3], %s4056_s25, %s4056_s25, %s4057_s26  }
   0x6   :  { %s4058_s27 = smov [#allocation5]   ;;  %s4059_s29 = smov 128  }
   0x7   :  { %s42_s28 = sshll.u32 %s4058_s27, 4  ;;  %s4060_s30 = smov 8   ;;  %s43_s28 = int_to_ptr.vmem [resolvable:$true] %s42_s28 }
   0x8   :  { %48 = dma.hbm_to_vmem [thread:$0]  %s41_s24, 8192, %s43_s28, [#allocation6], %s4059_s29, %s4059_s29, %s4060_s30  }
   0x9   :  { %4049 = dma.done.wait [#allocation3], 25088  }
   0xa   :  { %4050 = vsyncadd [#allocation3], 4294942208 }
   0xb   :  { %4051 = dma.done.wait [#allocation6], 8192  }
   0xc   :  { %4052 = vsyncadd [#allocation6], 4294959104  ;;  %v2617_v0 = vld [vmem:[#allocation2 + $0xe0] sm:$0xf]  ;;  %v3705_v1 = vld [vmem:[#allocation2 + $0xec] sm:$0xf0] }
   0xd   :  { %v2745_v2 = vld [vmem:[#allocation2 + $0x1e0] sm:$0xf]  ;;  %v2618_v3 = vor.u32 %v3705_v1, %v2617_v0  ;;  %v3737_v4 = vld [vmem:[#allocation2 + $0x1ec] sm:$0xf0]  ;;  %vm1286_vm0 = vcmask 130048   ;;  %s4061_s16 = smov [#allocation7]  }
   0xe   :  { %v2873_v5 = vld [vmem:[#allocation2 + $0x2e0] sm:$0xf]  ;;  %v3769_v6 = vld [vmem:[#allocation2 + $0x2ec] sm:$0xf0]  ;;  %v2746_v7 = vor.u32 %v3737_v4, %v2745_v2  ;;  %s2490_s17 = sshll.u32 %s4061_s16, 4  ;;  %s2491_s17 = int_to_ptr.vmem [resolvable:$true] %s2490_s17 }
   0xf   :  { %v2874_v8 = vor.u32 %v3769_v6, %v2873_v5  ;;  %v3001_v9 = vld [vmem:[#allocation2 + $0x3e0] sm:$0xf]  ;;  %v3801_v10 = vld [vmem:[#allocation2 + $0x3ec] sm:$0xf0]  ;;  %1290 = vmatpush.bf16.msra.mxu0 %v2618_v3 }
  0x10   :  { %v2601_v11 = vld [vmem:[#allocation2 + $0xc0] sm:$0xf]  ;;  %v3002_v12 = vor.u32 %v3801_v10, %v3001_v9  ;;  %v3701_v13 = vld [vmem:[#allocation2 + $0xcc] sm:$0xf0]  ;;  %1303 = vmatpush.bf16.msra.mxu1 %v2746_v7 }
  0x11   :  { %v2729_v14 = vld [vmem:[#allocation2 + $0x1c0] sm:$0xf]  ;;  %v3733_v15 = vld [vmem:[#allocation2 + $0x1cc] sm:$0xf0]  ;;  %1316 = vmatpush.bf16.msra.mxu2 %v2874_v8  ;;  %v2602_v16 = vor.u32 %v3701_v13, %v2601_v11 }
  0x12   :  { %v2730_v17 = vor.u32 %v3733_v15, %v2729_v14  ;;  %v2857_v18 = vld [vmem:[#allocation2 + $0x2c0] sm:$0xf]  ;;  %v3765_v19 = vld [vmem:[#allocation2 + $0x2cc] sm:$0xf0]  ;;  %1329 = vmatpush.bf16.msra.mxu3 %v3002_v12 }
  0x13   :  { %v2985_v20 = vld [vmem:[#allocation2 + $0x3c0] sm:$0xf]  ;;  %v2858_v21 = vor.u32 %v3765_v19, %v2857_v18  ;;  %v3797_v22 = vld [vmem:[#allocation2 + $0x3cc] sm:$0xf0]  ;;  %1291 = vmatpush.bf16.msra.mxu0 %v2602_v16 }
  0x14   :  { %v2585_v23 = vld [vmem:[#allocation2 + $0xa0] sm:$0xf]  ;;  %v3697_v24 = vld [vmem:[#allocation2 + $0xac] sm:$0xf0]  ;;  %v2986_v25 = vor.u32 %v3797_v22, %v2985_v20  ;;  %1304 = vmatpush.bf16.msra.mxu1 %v2730_v17 }
  0x15   :  { %v2713_v26 = vld [vmem:[#allocation2 + $0x1a0] sm:$0xf]  ;;  %v3729_v27 = vld [vmem:[#allocation2 + $0x1ac] sm:$0xf0]  ;;  %v2586_v29 = vor.u32 %v3697_v24, %v2585_v23  ;;  %1317 = vmatpush.bf16.msra.mxu2 %v2858_v21 }
  0x16   :  { %v2841_v28 = vld [vmem:[#allocation2 + $0x2a0] sm:$0xf]  ;;  %v3761_v30 = vld [vmem:[#allocation2 + $0x2ac] sm:$0xf0]  ;;  %v2714_v33 = vor.u32 %v3729_v27, %v2713_v26  ;;  %1330 = vmatpush.bf16.msra.mxu3 %v2986_v25  ;;  %v73_v25 = vld [vmem:[%s4331_s0 + $0x8] sm:$0xff] }
  0x17   :  { %v2969_v31 = vld [vmem:[#allocation2 + $0x3a0] sm:$0xf]  ;;  %v3793_v32 = vld [vmem:[#allocation2 + $0x3ac] sm:$0xf0]  ;;  %v2842_v34 = vor.u32 %v3761_v30, %v2841_v28  ;;  %1292 = vmatpush.bf16.msra.mxu0 %v2586_v29 }
  0x18   :  { %v2569_v35 = vld [vmem:[#allocation2 + $0x80] sm:$0xf]  ;;  %v3693_v36 = vld [vmem:[#allocation2 + $0x8c] sm:$0xf0]  ;;  %v2970_v38 = vor.u32 %v3793_v32, %v2969_v31  ;;  %1305 = vmatpush.bf16.msra.mxu1 %v2714_v33 }
  0x19   :  { %v2697_v37 = vld [vmem:[#allocation2 + $0x180] sm:$0xf]  ;;  %v3725_v39 = vld [vmem:[#allocation2 + $0x18c] sm:$0xf0]  ;;  %v2570_v44 = vor.u32 %v3693_v36, %v2569_v35  ;;  %1318 = vmatpush.bf16.msra.mxu2 %v2842_v34  ;;  %v3703_v34 = vld [vmem:[#allocation2 + $0xe4] sm:$0xf]  ;;  %v288_v36 = vunpack.c.l.b16 %v73_v25 }
  0x1a   :  { %v2825_v40 = vld [vmem:[#allocation2 + $0x280] sm:$0xf]  ;;  %v3757_v41 = vld [vmem:[#allocation2 + $0x28c] sm:$0xf0]  ;;  %v2698_v45 = vor.u32 %v3725_v39, %v2697_v37  ;;  %1331 = vmatpush.bf16.msra.mxu3 %v2970_v38  ;;  %v2619_v35 = vld [vmem:[#allocation2 + $0xf0] sm:$0xf0] }
  0x1b   :  { %v2953_v42 = vld [vmem:[#allocation2 + $0x380] sm:$0xf]  ;;  %v3789_v43 = vld [vmem:[#allocation2 + $0x38c] sm:$0xf0]  ;;  %v2826_v46 = vor.u32 %v3757_v41, %v2825_v40  ;;  %1293 = vmatpush.bf16.msra.mxu0 %v2570_v44 }
  0x1c   :  { %v2553_v47 = vld [vmem:[#allocation2 + $0x60] sm:$0xf]  ;;  %v3689_v48 = vld [vmem:[#allocation2 + $0x6c] sm:$0xf0]  ;;  %v2954_v50 = vor.u32 %v3789_v43, %v2953_v42  ;;  %1306 = vmatpush.bf16.msra.mxu1 %v2698_v45  ;;  %v289_v42 = vunpack.c.h.b16 %v73_v25  ;;  %v3723_v25 = vld [vmem:[#allocation2 + $0x184] sm:$0xf] }
  0x1d   :  { %v2681_v49 = vld [vmem:[#allocation2 + $0x160] sm:$0xf]  ;;  %v3721_v51 = vld [vmem:[#allocation2 + $0x16c] sm:$0xf0]  ;;  %v2554_v56 = vor.u32 %v3689_v48, %v2553_v47  ;;  %1319 = vmatpush.bf16.msra.mxu2 %v2826_v46  ;;  %v3735_v46 = vld [vmem:[#allocation2 + $0x1e4] sm:$0xf] }
  0x1e   :  { %v2809_v52 = vld [vmem:[#allocation2 + $0x260] sm:$0xf]  ;;  %v3753_v53 = vld [vmem:[#allocation2 + $0x26c] sm:$0xf0]  ;;  %v2682_v57 = vor.u32 %v3721_v51, %v2681_v49  ;;  %1332 = vmatpush.bf16.msra.mxu3 %v2954_v50  ;;  %v2747_v47 = vld [vmem:[#allocation2 + $0x1f0] sm:$0xf0]  ;;  %v2622_v49 = vor.u32 %v3703_v34, %v2619_v35 }
  0x1f   :  { %v2937_v54 = vld [vmem:[#allocation2 + $0x360] sm:$0xf]  ;;  %v3785_v55 = vld [vmem:[#allocation2 + $0x36c] sm:$0xf0]  ;;  %v2810_v58 = vor.u32 %v3753_v53, %v2809_v52  ;;  %1294 = vmatpush.bf16.msra.mxu0 %v2554_v56  ;;  %v4134_v53 = vpack.c.b16 %v288_v36, %v288_v36  ;;  %v2603_v56 = vld [vmem:[#allocation2 + $0xd0] sm:$0xf0] }
  0x20   :  { %v2537_v59 = vld [vmem:[#allocation2 + $0x40] sm:$0xf]  ;;  %v3685_v60 = vld [vmem:[#allocation2 + $0x4c] sm:$0xf0]  ;;  %v2938_v62 = vor.u32 %v3785_v55, %v2937_v54  ;;  %1307 = vmatpush.bf16.msra.mxu1 %v2682_v57  ;;  %v3699_v55 = vld [vmem:[#allocation2 + $0xc4] sm:$0xf] }
  0x21   :  { %v2665_v61 = vld [vmem:[#allocation2 + $0x140] sm:$0xf]  ;;  %v3717_v63 = vld [vmem:[#allocation2 + $0x14c] sm:$0xf0]  ;;  %v2538_v4 = vor.u32 %v3685_v60, %v2537_v59  ;;  %1320 = vmatpush.bf16.msra.mxu2 %v2810_v58  ;;  %v4138_v60 = vpack.c.b16 %v289_v42, %v289_v42  ;;  %v2555_v34 = vld [vmem:[#allocation2 + $0x70] sm:$0xf0] }
  0x22   :  { %v2793_v0 = vld [vmem:[#allocation2 + $0x240] sm:$0xf]  ;;  %v3749_v1 = vld [vmem:[#allocation2 + $0x24c] sm:$0xf0]  ;;  %v2666_v5 = vor.u32 %v3717_v63, %v2665_v61  ;;  %1333 = vmatpush.bf16.msra.mxu3 %v2938_v62  ;;  %v2750_v61 = vor.u32 %v3735_v46, %v2747_v47  ;;  %v3731_v63 = vld [vmem:[#allocation2 + $0x1c4] sm:$0xf] }
  0x23   :  { %v2921_v2 = vld [vmem:[#allocation2 + $0x340] sm:$0xf]  ;;  %v3781_v3 = vld [vmem:[#allocation2 + $0x34c] sm:$0xf0]  ;;  %v2794_v6 = vor.u32 %v3749_v1, %v2793_v0  ;;  %1295 = vmatpush.bf16.msra.mxu0 %v2538_v4  ;;  %v2731_v0 = vld [vmem:[#allocation2 + $0x1d0] sm:$0xf0] }
  0x24   :  { %v2521_v7 = vld [vmem:[#allocation2 + $0x20] sm:$0xf]  ;;  %v3681_v8 = vld [vmem:[#allocation2 + $0x2c] sm:$0xf0]  ;;  %v2922_v10 = vor.u32 %v3781_v3, %v2921_v2  ;;  %1308 = vmatpush.bf16.msra.mxu1 %v2666_v5  ;;  %v2606_v2 = vor.u32 %v3699_v55, %v2603_v56  ;;  %v3683_v46 = vld [vmem:[#allocation2 + $0x44] sm:$0xf] }
  0x25   :  { %v2649_v9 = vld [vmem:[#allocation2 + $0x120] sm:$0xf]  ;;  %v3713_v11 = vld [vmem:[#allocation2 + $0x12c] sm:$0xf0]  ;;  %v2522_v17 = vor.u32 %v3681_v8, %v2521_v7  ;;  %1321 = vmatpush.bf16.msra.mxu2 %v2794_v6  ;;  %v3695_v7 = vld [vmem:[#allocation2 + $0xa4] sm:$0xf] }
  0x26   :  { %v2777_v12 = vld [vmem:[#allocation2 + $0x220] sm:$0xf]  ;;  %v3745_v13 = vld [vmem:[#allocation2 + $0x22c] sm:$0xf0]  ;;  %v2650_v21 = vor.u32 %v3713_v11, %v2649_v9  ;;  %1334 = vmatpush.bf16.msra.mxu3 %v2922_v10  ;;  %v2587_v8 = vld [vmem:[#allocation2 + $0xb0] sm:$0xf0]  ;;  %v2734_v10 = vor.u32 %v3731_v63, %v2731_v0 }
  0x27   :  { %v2905_v14 = vld [vmem:[#allocation2 + $0x320] sm:$0xf]  ;;  %v3777_v15 = vld [vmem:[#allocation2 + $0x32c] sm:$0xf0]  ;;  %v2778_v22 = vor.u32 %v3745_v13, %v2777_v12  ;;  %1296 = vmatpush.bf16.msra.mxu0 %v2522_v17  ;;  %v3727_v12 = vld [vmem:[#allocation2 + $0x1a4] sm:$0xf] }
  0x28   :  { %v2505_v16 = vld [vmem:[#allocation2] sm:$0xf]  ;;  %v3677_v18 = vld [vmem:[#allocation2 + $0xc] sm:$0xf0]  ;;  %v2906_v26 = vor.u32 %v3777_v15, %v2905_v14  ;;  %1309 = vmatpush.bf16.msra.mxu1 %v2650_v21  ;;  %v2715_v13 = vld [vmem:[#allocation2 + $0x1b0] sm:$0xf0]  ;;  %v2590_v15 = vor.u32 %v3695_v7, %v2587_v8 }
  0x29   :  { %v2633_v19 = vld [vmem:[#allocation2 + $0x100] sm:$0xf]  ;;  %v3709_v20 = vld [vmem:[#allocation2 + $0x10c] sm:$0xf0]  ;;  %v2506_v33 = vor.u32 %v3677_v18, %v2505_v16  ;;  %1322 = vmatpush.bf16.msra.mxu2 %v2778_v22  ;;  %v2571_v21 = vld [vmem:[#allocation2 + $0x90] sm:$0xf0] }
  0x2a   :  { %v2761_v23 = vld [vmem:[#allocation2 + $0x200] sm:$0xf]  ;;  %v3741_v24 = vld [vmem:[#allocation2 + $0x20c] sm:$0xf0]  ;;  %v2634_v38 = vor.u32 %v3709_v20, %v2633_v19  ;;  %1335 = vmatpush.bf16.msra.mxu3 %v2906_v26  ;;  %v3691_v20 = vld [vmem:[#allocation2 + $0x84] sm:$0xf] }
  0x2b   :  { %v2889_v27 = vld [vmem:[#allocation2 + $0x300] sm:$0xf]  ;;  %v3773_v28 = vld [vmem:[#allocation2 + $0x30c] sm:$0xf0]  ;;  %v2762_v39 = vor.u32 %v3741_v24, %v2761_v23  ;;  %1297 = vmatpush.bf16.msra.mxu0 %v2506_v33  ;;  %v75_v22 = vld [vmem:[%s4331_s0 + $0x18] sm:$0xf]  ;;  %v2718_v23 = vor.u32 %v3727_v12, %v2715_v13 }
  0x2c   :  { %v3129_v29 = vld [vmem:[#allocation2 + $0x4e0] sm:$0xf]  ;;  %v3833_v30 = vld [vmem:[#allocation2 + $0x4ec] sm:$0xf0]  ;;  %v2890_v43 = vor.u32 %v3773_v28, %v2889_v27  ;;  %1310 = vmatpush.bf16.msra.mxu1 %v2634_v38  ;;  %v2699_v26 = vld [vmem:[#allocation2 + $0x190] sm:$0xf0]  ;;  %v2574_v28 = vor.u32 %v3691_v20, %v2571_v21  ;;  %v292_v35 = vunpack.c.l.b16 %v75_v22 }
  0x2d   :  { %v3257_v31 = vld [vmem:[#allocation2 + $0x5e0] sm:$0xf]  ;;  %v3865_v32 = vld [vmem:[#allocation2 + $0x5ec] sm:$0xf0]  ;;  %v3130_v44 = vor.u32 %v3833_v30, %v3129_v29  ;;  %1323 = vmatpush.bf16.msra.mxu2 %v2762_v39  ;;  %v3687_v33 = vld [vmem:[#allocation2 + $0x64] sm:$0xf]  ;;  %v2702_v36 = vor.u32 %v3723_v25, %v2699_v26 }
  0x2e   :  { %v72_v37 = vld [vmem:[%s4331_s0] sm:$0xff]  ;;  %v3869_v45 = vld [vmem:[#allocation2 + $0x60c] sm:$0xf0]  ;;  %v3258_v48 = vor.u32 %v3865_v32, %v3257_v31  ;;  %1336 = vmatpush.bf16.msra.mxu3 %v2890_v43  ;;  %v2683_v39 = vld [vmem:[#allocation2 + $0x170] sm:$0xf0] }
  0x2f   :  { %v3273_v40 = vld [vmem:[#allocation2 + $0x600] sm:$0xf]  ;;  %v286_v41 = vunpack.c.l.b16 %v72_v37  ;;  %v3829_v51 = vld [vmem:[#allocation2 + $0x4cc] sm:$0xf0]  ;;  %v287_v58 = vunpack.c.h.b16 %v72_v37  ;;  %1342 = vmatpush.bf16.msrb.mxu0 %v3130_v44  ;;  %v3719_v38 = vld [vmem:[#allocation2 + $0x164] sm:$0xf] }
  0x30   :  { %v3113_v50 = vld [vmem:[#allocation2 + $0x4c0] sm:$0xf]  ;;  %v3861_v54 = vld [vmem:[#allocation2 + $0x5cc] sm:$0xf0]  ;;  %v3274_v59 = vor.u32 %v3869_v45, %v3273_v40  ;;  %1355 = vmatpush.bf16.msrb.mxu1 %v3258_v48  ;;  %1324 = vmatmul.bf16.vlgmr.msra.gmra.mxu2 %v4134_v53  ;;  %v2539_v47 = vld [vmem:[#allocation2 + $0x50] sm:$0xf0]  ;;  %v4149_v48 = vpack.c.b16 %v292_v35, %v292_v35 }
  0x31   :  { %v3241_v52 = vld [vmem:[#allocation2 + $0x5c0] sm:$0xf]  ;;  %v4136_v57 = vpack.c.b16 %v286_v41, %v286_v41  ;;  %v3114_v62 = vor.u32 %v3829_v51, %v3113_v50  ;;  %v3825_v4 = vld [vmem:[#allocation2 + $0x4ac] sm:$0xf0]  ;;  %v4142_v9 = vpack.c.b16 %v287_v58, %v287_v58  ;;  %1337 = vmatmul.bf16.vlgmr.msra.gmra.mxu3 %v4138_v60  ;;  %v2558_v41 = vor.u32 %v3687_v33, %v2555_v34  ;;  %v3715_v51 = vld [vmem:[#allocation2 + $0x144] sm:$0xf] }
  0x32   :  { %1381 = vmatpush.bf16.msrb.mxu3 %v2622_v49  ;;  %v3242_v1 = vor.u32 %v3861_v54, %v3241_v52  ;;  %v3097_v3 = vld [vmem:[#allocation2 + $0x4a0] sm:$0xf]  ;;  %v3857_v6 = vld [vmem:[#allocation2 + $0x5ac] sm:$0xf0]  ;;  %1375 = vmatpush.bf16.msrb.mxu2 %v3274_v59  ;;  %v2686_v49 = vor.u32 %v3719_v38, %v2683_v39  ;;  %v2667_v52 = vld [vmem:[#allocation2 + $0x150] sm:$0xf0]  ;;  %v2542_v55 = vor.u32 %v3683_v46, %v2539_v47 }
  0x33   :  { %v3225_v5 = vld [vmem:[#allocation2 + $0x5a0] sm:$0xf]  ;;  %1298 = vmatmul.bf16.vlgmr.msra.gmra.mxu0 %v4136_v57  ;;  %v3098_v11 = vor.u32 %v3825_v4, %v3097_v3  ;;  %v3821_v17 = vld [vmem:[#allocation2 + $0x48c] sm:$0xf0]  ;;  %1311 = vmatmul.bf16.vlgmr.msra.gmra.mxu1 %v4142_v9  ;;  %v2523_v63 = vld [vmem:[#allocation2 + $0x30] sm:$0xf0] }
  0x34   :  { %1343 = vmatpush.bf16.msrb.mxu0 %v3114_v62  ;;  %1356 = vmatpush.bf16.msrb.mxu1 %v3242_v1  ;;  %v3226_v14 = vor.u32 %v3857_v6, %v3225_v5  ;;  %v3081_v16 = vld [vmem:[#allocation2 + $0x480] sm:$0xf]  ;;  %v3853_v19 = vld [vmem:[#allocation2 + $0x58c] sm:$0xf0]  ;;  %v3679_v62 = vld [vmem:[#allocation2 + $0x24] sm:$0xf]  ;;  %v2670_v1 = vor.u32 %v3715_v51, %v2667_v52 }
  0x35   :  { %v3209_v18 = vld [vmem:[#allocation2 + $0x580] sm:$0xf]  ;;  %v3082_v24 = vor.u32 %v3821_v17, %v3081_v16  ;;  %v3817_v30 = vld [vmem:[#allocation2 + $0x46c] sm:$0xf0]  ;;  %v3711_v0 = vld [vmem:[#allocation2 + $0x124] sm:$0xf]  ;;  %v2526_v7 = vor.u32 %v3679_v62, %v2523_v63 }
  0x36   :  { %1394 = vmatpush.bf16.msra.mxu2 %v2750_v61  ;;  %1382 = vmatpush.bf16.msrb.mxu3 %v2606_v2  ;;  %v3210_v27 = vor.u32 %v3853_v19, %v3209_v18  ;;  %v3065_v29 = vld [vmem:[#allocation2 + $0x460] sm:$0xf]  ;;  %v3849_v32 = vld [vmem:[#allocation2 + $0x56c] sm:$0xf0]  ;;  %v2651_v3 = vld [vmem:[#allocation2 + $0x130] sm:$0xf0] }
  0x37   :  { %v3193_v31 = vld [vmem:[#allocation2 + $0x560] sm:$0xf]  ;;  %v3066_v37 = vor.u32 %v3817_v30, %v3065_v29  ;;  %v3813_v43 = vld [vmem:[#allocation2 + $0x44c] sm:$0xf0]  ;;  %v3675_v12 = vld [vmem:[#allocation2 + $0x4] sm:$0xf]  ;;  %v2654_v19 = vor.u32 %v3711_v0, %v2651_v3 }
  0x38   :  { %1344 = vmatpush.bf16.msrb.mxu0 %v3098_v11  ;;  %1357 = vmatpush.bf16.msrb.mxu1 %v3226_v14  ;;  %v3194_v40 = vor.u32 %v3849_v32, %v3193_v31  ;;  %v3049_v42 = vld [vmem:[#allocation2 + $0x440] sm:$0xf]  ;;  %v3845_v45 = vld [vmem:[#allocation2 + $0x54c] sm:$0xf0]  ;;  %v2507_v13 = vld [vmem:[#allocation2 + $0x10] sm:$0xf0] }
  0x39   :  { %v3177_v44 = vld [vmem:[#allocation2 + $0x540] sm:$0xf]  ;;  %v3050_v50 = vor.u32 %v3813_v43, %v3049_v42  ;;  %v3809_v58 = vld [vmem:[#allocation2 + $0x42c] sm:$0xf0]  ;;  %v3767_v14 = vld [vmem:[#allocation2 + $0x2e4] sm:$0xf]  ;;  %v2510_v25 = vor.u32 %v3675_v12, %v2507_v13 }
  0x3a   :  { %1395 = vmatpush.bf16.msra.mxu2 %v2734_v10  ;;  %1383 = vmatpush.bf16.msrb.mxu3 %v2590_v15  ;;  %v3178_v54 = vor.u32 %v3845_v45, %v3177_v44  ;;  %v3033_v56 = vld [vmem:[#allocation2 + $0x420] sm:$0xf]  ;;  %v3841_v61 = vld [vmem:[#allocation2 + $0x52c] sm:$0xf0]  ;;  %v2875_v15 = vld [vmem:[#allocation2 + $0x2f0] sm:$0xf0] }
  0x3b   :  { %v3161_v59 = vld [vmem:[#allocation2 + $0x520] sm:$0xf]  ;;  %v3034_v2 = vor.u32 %v3809_v58, %v3033_v56  ;;  %v74_v5 = vld [vmem:[%s4331_s0 + $0x10] sm:$0xff]  ;;  %v3799_v16 = vld [vmem:[#allocation2 + $0x3e4] sm:$0xf] }
  0x3c   :  { %1345 = vmatpush.bf16.msrb.mxu0 %v3082_v24  ;;  %1358 = vmatpush.bf16.msrb.mxu1 %v3210_v27  ;;  %v3017_v4 = vld [vmem:[#allocation2 + $0x400] sm:$0xf]  ;;  %v3162_v6 = vor.u32 %v3841_v61, %v3161_v59  ;;  %v3805_v8 = vld [vmem:[#allocation2 + $0x40c] sm:$0xf0]  ;;  %v3003_v17 = vld [vmem:[#allocation2 + $0x3f0] sm:$0xf0]  ;;  %v290_v18 = vunpack.c.l.b16 %v74_v5 }
  0x3d   :  { %v3145_v10 = vld [vmem:[#allocation2 + $0x500] sm:$0xf]  ;;  %v3837_v11 = vld [vmem:[#allocation2 + $0x50c] sm:$0xf0]  ;;  %v3018_v20 = vor.u32 %v3805_v8, %v3017_v4  ;;  %v3831_v21 = vld [vmem:[#allocation2 + $0x4e4] sm:$0xf]  ;;  %v3006_v29 = vor.u32 %v3799_v16, %v3003_v17 }
  0x3e   :  { %1396 = vmatpush.bf16.msra.mxu2 %v2718_v23  ;;  %1384 = vmatpush.bf16.msrb.mxu3 %v2574_v28  ;;  %v3131_v22 = vld [vmem:[#allocation2 + $0x4f0] sm:$0xf0]  ;;  %v291_v23 = vunpack.c.h.b16 %v74_v5  ;;  %v3146_v24 = vor.u32 %v3837_v11, %v3145_v10  ;;  %v3707_v26 = vld [vmem:[#allocation2 + $0x104] sm:$0xf]  ;;  %v2878_v28 = vor.u32 %v3767_v14, %v2875_v15  ;;  %v4156_v34 = vpack.c.b16 %v290_v18, %v290_v18 }
  0x3f   :  { %v2635_v27 = vld [vmem:[#allocation2 + $0x110] sm:$0xf0]  ;;  %v3863_v30 = vld [vmem:[#allocation2 + $0x5e4] sm:$0xf]  ;;  %v3134_v33 = vor.u32 %v3831_v21, %v3131_v22 }
  0x40   :  { %1346 = vmatpush.bf16.msrb.mxu0 %v3066_v37  ;;  %1359 = vmatpush.bf16.msrb.mxu1 %v3194_v40  ;;  %v3259_v31 = vld [vmem:[#allocation2 + $0x5f0] sm:$0xf0]  ;;  %v3763_v32 = vld [vmem:[#allocation2 + $0x2c4] sm:$0xf]  ;;  %v2638_v38 = vor.u32 %v3707_v26, %v2635_v27  ;;  %v4158_v39 = vpack.c.b16 %v291_v23, %v291_v23 }
  0x41   :  { %3287 = vmatmul.msk.bf16.vlgmr.msrb.gmra.mxu2 %vm1286_vm0, %v4149_v48  ;;  %v2859_v35 = vld [vmem:[#allocation2 + $0x2d0] sm:$0xf0]  ;;  %v3827_v40 = vld [vmem:[#allocation2 + $0x4c4] sm:$0xf]  ;;  %v3262_v42 = vor.u32 %v3863_v30, %v3259_v31 }
  0x42   :  { %1397 = vmatpush.bf16.msra.mxu2 %v2702_v36  ;;  %1385 = vmatpush.bf16.msrb.mxu3 %v2558_v41  ;;  %v3795_v36 = vld [vmem:[#allocation2 + $0x3c4] sm:$0xf]  ;;  %v2987_v37 = vld [vmem:[#allocation2 + $0x3d0] sm:$0xf0]  ;;  %v2862_v43 = vor.u32 %v3763_v32, %v2859_v35 }
  0x43   :  { %v3115_v41 = vld [vmem:[#allocation2 + $0x4d0] sm:$0xf0]  ;;  %v2990_v44 = vor.u32 %v3795_v36, %v2987_v37  ;;  %v3859_v45 = vld [vmem:[#allocation2 + $0x5c4] sm:$0xf] }
  0x44   :  { %1347 = vmatpush.bf16.msrb.mxu0 %v3050_v50  ;;  %1360 = vmatpush.bf16.msrb.mxu1 %v3178_v54  ;;  %v3243_v46 = vld [vmem:[#allocation2 + $0x5d0] sm:$0xf0]  ;;  %v3759_v47 = vld [vmem:[#allocation2 + $0x2a4] sm:$0xf] }
  0x45   :  { %v2843_v50 = vld [vmem:[#allocation2 + $0x2b0] sm:$0xf0]  ;;  %v3791_v51 = vld [vmem:[#allocation2 + $0x3a4] sm:$0xf]  ;;  %v3246_v56 = vor.u32 %v3859_v45, %v3243_v46 }
  0x46   :  { %1398 = vmatpush.bf16.msra.mxu2 %v2686_v49  ;;  %1386 = vmatpush.bf16.msrb.mxu3 %v2542_v55  ;;  %v3118_v49 = vor.u32 %v3827_v40, %v3115_v41  ;;  %v2971_v52 = vld [vmem:[#allocation2 + $0x3b0] sm:$0xf0]  ;;  %v3823_v54 = vld [vmem:[#allocation2 + $0x4a4] sm:$0xf]  ;;  %v2846_v58 = vor.u32 %v3759_v47, %v2843_v50 }
  0x47   :  { %v3099_v55 = vld [vmem:[#allocation2 + $0x4b0] sm:$0xf0]  ;;  %v2974_v59 = vor.u32 %v3791_v51, %v2971_v52  ;;  %v3855_v61 = vld [vmem:[#allocation2 + $0x5a4] sm:$0xf] }
  0x48   :  { %1348 = vmatpush.bf16.msrb.mxu0 %v3034_v2  ;;  %1361 = vmatpush.bf16.msrb.mxu1 %v3162_v6  ;;  %v3227_v62 = vld [vmem:[#allocation2 + $0x5b0] sm:$0xf0]  ;;  %v3755_v63 = vld [vmem:[#allocation2 + $0x284] sm:$0xf]  ;;  %v3102_v0 = vor.u32 %v3823_v54, %v3099_v55 }
  0x49   :  { %v3787_v2 = vld [vmem:[#allocation2 + $0x384] sm:$0xf]  ;;  %v2955_v3 = vld [vmem:[#allocation2 + $0x390] sm:$0xf0]  ;;  %v3230_v6 = vor.u32 %v3855_v61, %v3227_v62  ;;  %v2625_v61 = vld [vmem:[#allocation2 + $0xe8] sm:$0xf] }
  0x4a   :  { %1399 = vmatpush.bf16.msra.mxu2 %v2670_v1  ;;  %1387 = vmatpush.bf16.msrb.mxu3 %v2526_v7  ;;  %v2827_v1 = vld [vmem:[#allocation2 + $0x290] sm:$0xf0]  ;;  %v3819_v4 = vld [vmem:[#allocation2 + $0x484] sm:$0xf]  ;;  %v2958_v8 = vor.u32 %v3787_v2, %v2955_v3  ;;  %v3706_v62 = vld [vmem:[#allocation2 + $0xf4] sm:$0xf0] }
  0x4b   :  { %v3083_v5 = vld [vmem:[#allocation2 + $0x490] sm:$0xf0]  ;;  %v2830_v7 = vor.u32 %v3755_v63, %v2827_v1  ;;  %v3851_v10 = vld [vmem:[#allocation2 + $0x584] sm:$0xf]  ;;  %v2881_v2 = vld [vmem:[#allocation2 + $0x2e8] sm:$0xf] }
  0x4c   :  { %1349 = vmatpush.bf16.msrb.mxu0 %v3018_v20  ;;  %1362 = vmatpush.bf16.msrb.mxu1 %v3146_v24  ;;  %v3211_v11 = vld [vmem:[#allocation2 + $0x590] sm:$0xf0]  ;;  %v3751_v12 = vld [vmem:[#allocation2 + $0x264] sm:$0xf]  ;;  %v3086_v13 = vor.u32 %v3819_v4, %v3083_v5  ;;  %v3770_v3 = vld [vmem:[#allocation2 + $0x2f4] sm:$0xf0] }
  0x4d   :  { %v2811_v14 = vld [vmem:[#allocation2 + $0x270] sm:$0xf0]  ;;  %v3783_v15 = vld [vmem:[#allocation2 + $0x364] sm:$0xf] }
  0x4e   :  { %1400 = vmatpush.bf16.msra.mxu2 %v2654_v19  ;;  %1388 = vmatpush.bf16.msrb.mxu3 %v2510_v25  ;;  %v2939_v16 = vld [vmem:[#allocation2 + $0x370] sm:$0xf0]  ;;  %v3815_v17 = vld [vmem:[#allocation2 + $0x464] sm:$0xf]  ;;  %v3214_v19 = vor.u32 %v3851_v10, %v3211_v11  ;;  %v2814_v20 = vor.u32 %v3751_v12, %v2811_v14  ;;  %v2626_v10 = vor.u32 %v3706_v62, %v2625_v61  ;;  %v3009_v11 = vld [vmem:[#allocation2 + $0x3e8] sm:$0xf] }
  0x4f   :  { %1350 = vmatmul.bf16.vlgmr.msrb.gmra.mxu0 %v4156_v34  ;;  %1363 = vmatmul.bf16.vlgmr.msrb.gmra.mxu1 %v4158_v39  ;;  %v3067_v18 = vld [vmem:[#allocation2 + $0x470] sm:$0xf0]  ;;  %v2942_v21 = vor.u32 %v3783_v15, %v2939_v16  ;;  %v3847_v22 = vld [vmem:[#allocation2 + $0x564] sm:$0xf]  ;;  %v3802_v12 = vld [vmem:[#allocation2 + $0x3f4] sm:$0xf0]  ;;  %v2882_v16 = vor.u32 %v3770_v3, %v2881_v2 }
  0x50   :  { %1407 = vmatpush.bf16.msra.mxu0 %v2878_v28  ;;  %1420 = vmatpush.bf16.msra.mxu1 %v3006_v29  ;;  %v3195_v23 = vld [vmem:[#allocation2 + $0x570] sm:$0xf0]  ;;  %v3747_v24 = vld [vmem:[#allocation2 + $0x244] sm:$0xf]  ;;  %v3070_v25 = vor.u32 %v3815_v17, %v3067_v18  ;;  %v2753_v14 = vld [vmem:[#allocation2 + $0x1e8] sm:$0xf] }
  0x51   :  { %1389 = vmatmul.bf16.vlgmr.msrb.gmra.mxu3 %v4136_v57  ;;  %v2795_v26 = vld [vmem:[#allocation2 + $0x250] sm:$0xf0]  ;;  %v3779_v27 = vld [vmem:[#allocation2 + $0x344] sm:$0xf]  ;;  %v3198_v31 = vor.u32 %v3847_v22, %v3195_v23  ;;  %v3738_v15 = vld [vmem:[#allocation2 + $0x1f4] sm:$0xf0] }
  0x52   :  { %1433 = vmatpush.bf16.msra.mxu3 %v3134_v33  ;;  %1401 = vmatpush.bf16.msra.mxu2 %v2638_v38  ;;  %v2923_v28 = vld [vmem:[#allocation2 + $0x350] sm:$0xf0]  ;;  %v3811_v29 = vld [vmem:[#allocation2 + $0x444] sm:$0xf]  ;;  %v2798_v33 = vor.u32 %v3747_v24, %v2795_v26  ;;  %v2609_v18 = vld [vmem:[#allocation2 + $0xc8] sm:$0xf]  ;;  %v2754_v23 = vor.u32 %v3738_v15, %v2753_v14 }
  0x53   :  { %v3051_v30 = vld [vmem:[#allocation2 + $0x450] sm:$0xf0]  ;;  %v3843_v32 = vld [vmem:[#allocation2 + $0x544] sm:$0xf]  ;;  %v2926_v35 = vor.u32 %v3779_v27, %v2923_v28  ;;  %v3766_v22 = vld [vmem:[#allocation2 + $0x2d4] sm:$0xf0] }
  0x54   :  { %1408 = vmatpush.bf16.msra.mxu0 %v2862_v43  ;;  %1421 = vmatpush.bf16.msra.mxu1 %v2990_v44  ;;  %v3179_v36 = vld [vmem:[#allocation2 + $0x550] sm:$0xf0]  ;;  %v3743_v37 = vld [vmem:[#allocation2 + $0x224] sm:$0xf]  ;;  %v3054_v40 = vor.u32 %v3811_v29, %v3051_v30  ;;  %v2993_v24 = vld [vmem:[#allocation2 + $0x3c8] sm:$0xf] }
  0x55   :  { %1402 = vmatmul.bf16.vlgmr.msra.gmra.mxu2 %v4142_v9  ;;  %v2779_v38 = vld [vmem:[#allocation2 + $0x230] sm:$0xf0]  ;;  %v3775_v41 = vld [vmem:[#allocation2 + $0x324] sm:$0xf]  ;;  %v3182_v46 = vor.u32 %v3843_v32, %v3179_v36  ;;  %v2737_v27 = vld [vmem:[#allocation2 + $0x1c8] sm:$0xf] }
  0x56   :  { %1446 = vmatpush.bf16.msrb.mxu2 %v3262_v42  ;;  %1434 = vmatpush.bf16.msra.mxu3 %v3118_v49  ;;  %v2907_v42 = vld [vmem:[#allocation2 + $0x330] sm:$0xf0]  ;;  %v3807_v43 = vld [vmem:[#allocation2 + $0x424] sm:$0xf]  ;;  %v2782_v51 = vor.u32 %v3743_v37, %v2779_v38  ;;  %v3734_v28 = vld [vmem:[#allocation2 + $0x1d4] sm:$0xf0] }
  0x57   :  { %v3035_v44 = vld [vmem:[#allocation2 + $0x430] sm:$0xf0]  ;;  %v3839_v45 = vld [vmem:[#allocation2 + $0x524] sm:$0xf]  ;;  %v2910_v52 = vor.u32 %v3775_v41, %v2907_v42  ;;  %v2593_v30 = vld [vmem:[#allocation2 + $0xa8] sm:$0xf]  ;;  %v2738_v36 = vor.u32 %v3734_v28, %v2737_v27 }
  0x58   :  { %1409 = vmatpush.bf16.msra.mxu0 %v2846_v58  ;;  %1422 = vmatpush.bf16.msra.mxu1 %v2974_v59  ;;  %v3163_v47 = vld [vmem:[#allocation2 + $0x530] sm:$0xf0]  ;;  %v3739_v49 = vld [vmem:[#allocation2 + $0x204] sm:$0xf]  ;;  %v2977_v37 = vld [vmem:[#allocation2 + $0x3a8] sm:$0xf] }
  0x59   :  { %v2763_v50 = vld [vmem:[#allocation2 + $0x210] sm:$0xf0]  ;;  %v3771_v54 = vld [vmem:[#allocation2 + $0x304] sm:$0xf]  ;;  %v3794_v38 = vld [vmem:[#allocation2 + $0x3b4] sm:$0xf0] }
  0x5a   :  { %1447 = vmatpush.bf16.msrb.mxu2 %v3246_v56  ;;  %1435 = vmatpush.bf16.msra.mxu3 %v3102_v0  ;;  %v2891_v55 = vld [vmem:[#allocation2 + $0x310] sm:$0xf0]  ;;  %v3038_v56 = vor.u32 %v3807_v43, %v3035_v44  ;;  %v3803_v58 = vld [vmem:[#allocation2 + $0x404] sm:$0xf]  ;;  %v3166_v0 = vor.u32 %v3839_v45, %v3163_v47  ;;  %v2766_v4 = vor.u32 %v3739_v49, %v2763_v50  ;;  %v2721_v41 = vld [vmem:[#allocation2 + $0x1a8] sm:$0xf] }
  0x5b   :  { %v3019_v59 = vld [vmem:[#allocation2 + $0x410] sm:$0xf0]  ;;  %v3867_v63 = vld [vmem:[#allocation2 + $0x604] sm:$0xf]  ;;  %v2894_v5 = vor.u32 %v3771_v54, %v2891_v55  ;;  %v3730_v42 = vld [vmem:[#allocation2 + $0x1b4] sm:$0xf0] }
  0x5c   :  { %1410 = vmatpush.bf16.msra.mxu0 %v2830_v7  ;;  %1423 = vmatpush.bf16.msra.mxu1 %v2958_v8  ;;  %v3275_v1 = vld [vmem:[#allocation2 + $0x610] sm:$0xf0]  ;;  %v3022_v8 = vor.u32 %v3803_v58, %v3019_v59  ;;  %v2577_v44 = vld [vmem:[#allocation2 + $0x88] sm:$0xf]  ;;  %v3694_v45 = vld [vmem:[#allocation2 + $0x94] sm:$0xf0]  ;;  %v2722_v50 = vor.u32 %v3730_v42, %v2721_v41 }
  0x5d   :  { %v3147_v7 = vld [vmem:[#allocation2 + $0x510] sm:$0xf0]  ;;  %v2833_v47 = vld [vmem:[#allocation2 + $0x288] sm:$0xf]  ;;  %v3758_v49 = vld [vmem:[#allocation2 + $0x294] sm:$0xf0]  ;;  %v2578_v54 = vor.u32 %v3694_v45, %v2577_v44 }
  0x5e   :  { %1448 = vmatpush.bf16.msrb.mxu2 %v3230_v6  ;;  %1436 = vmatpush.bf16.msra.mxu3 %v3086_v13  ;;  %v3835_v6 = vld [vmem:[#allocation2 + $0x504] sm:$0xf]  ;;  %v3278_v13 = vor.u32 %v3867_v63, %v3275_v1  ;;  %v2705_v55 = vld [vmem:[#allocation2 + $0x188] sm:$0xf]  ;;  %v2834_v58 = vor.u32 %v3758_v49, %v2833_v47  ;;  %v3690_v61 = vld [vmem:[#allocation2 + $0x74] sm:$0xf0] }
  0x5f   :  { %v3150_v17 = vor.u32 %v3835_v6, %v3147_v7  ;;  %v2561_v59 = vld [vmem:[#allocation2 + $0x68] sm:$0xf]  ;;  %v3786_v3 = vld [vmem:[#allocation2 + $0x374] sm:$0xf0] }
  0x60   :  { %1411 = vmatpush.bf16.msra.mxu0 %v2814_v20  ;;  %1424 = vmatpush.bf16.msra.mxu1 %v2942_v21  ;;  %v3010_v20 = vor.u32 %v3802_v12, %v3009_v11  ;;  %v2865_v21 = vld [vmem:[#allocation2 + $0x2c8] sm:$0xf]  ;;  %v3722_v6 = vld [vmem:[#allocation2 + $0x174] sm:$0xf0] }
  0x61   :  { %v2866_v29 = vor.u32 %v3766_v22, %v2865_v21  ;;  %v2817_v63 = vld [vmem:[#allocation2 + $0x268] sm:$0xf]  ;;  %v3682_v22 = vld [vmem:[#allocation2 + $0x34] sm:$0xf0] }
  0x62   :  { %1449 = vmatpush.bf16.msrb.mxu2 %v3214_v19  ;;  %1437 = vmatpush.bf16.msra.mxu3 %v3070_v25  ;;  %v3702_v19 = vld [vmem:[#allocation2 + $0xd4] sm:$0xf0]  ;;  %v2945_v2 = vld [vmem:[#allocation2 + $0x368] sm:$0xf] }
  0x63   :  { %v3798_v25 = vld [vmem:[#allocation2 + $0x3d4] sm:$0xf0]  ;;  %v2610_v26 = vor.u32 %v3702_v19, %v2609_v18  ;;  %v2946_v11 = vor.u32 %v3786_v3, %v2945_v2  ;;  %v2801_v12 = vld [vmem:[#allocation2 + $0x248] sm:$0xf] }
  0x64   :  { %1412 = vmatpush.bf16.msra.mxu0 %v2798_v33  ;;  %1425 = vmatpush.bf16.msra.mxu1 %v2926_v35  ;;  %v2994_v32 = vor.u32 %v3798_v25, %v2993_v24  ;;  %v2849_v33 = vld [vmem:[#allocation2 + $0x2a8] sm:$0xf]  ;;  %v3762_v35 = vld [vmem:[#allocation2 + $0x2b4] sm:$0xf0] }
  0x65   :  { %v2850_v43 = vor.u32 %v3762_v35, %v2849_v33  ;;  %v2929_v15 = vld [vmem:[#allocation2 + $0x348] sm:$0xf]  ;;  %v3718_v19 = vld [vmem:[#allocation2 + $0x154] sm:$0xf0] }
  0x66   :  { %1450 = vmatpush.bf16.msrb.mxu2 %v3198_v31  ;;  %1438 = vmatpush.bf16.msra.mxu3 %v3054_v40  ;;  %v3698_v31 = vld [vmem:[#allocation2 + $0xb4] sm:$0xf0]  ;;  %v2673_v18 = vld [vmem:[#allocation2 + $0x148] sm:$0xf] }
  0x67   :  { %v2594_v40 = vor.u32 %v3698_v31, %v2593_v30  ;;  %v2529_v21 = vld [vmem:[#allocation2 + $0x28] sm:$0xf]  ;;  %v3746_v25 = vld [vmem:[#allocation2 + $0x234] sm:$0xf0] }
  0x68   :  { %1413 = vmatpush.bf16.msra.mxu0 %v2782_v51  ;;  %1426 = vmatpush.bf16.msra.mxu1 %v2910_v52  ;;  %v2961_v51 = vld [vmem:[#allocation2 + $0x388] sm:$0xf]  ;;  %v3790_v52 = vld [vmem:[#allocation2 + $0x394] sm:$0xf0] }
  0x69   :  { %v2962_v62 = vor.u32 %v3790_v52, %v2961_v51  ;;  %v2785_v24 = vld [vmem:[#allocation2 + $0x228] sm:$0xf]  ;;  %v3778_v28 = vld [vmem:[#allocation2 + $0x334] sm:$0xf0]  ;;  %v3704_v51 = vld [vmem:[#allocation2 + $0xec] sm:$0xf] }
  0x6a   :  { %1451 = vmatpush.bf16.msrb.mxu2 %v3182_v46  ;;  %1439 = vmatpush.bf16.msra.mxu3 %v3038_v56  ;;  %v2978_v46 = vor.u32 %v3794_v38, %v2977_v37  ;;  %v3726_v56 = vld [vmem:[#allocation2 + $0x194] sm:$0xf0]  ;;  %v2913_v27 = vld [vmem:[#allocation2 + $0x328] sm:$0xf]  ;;  %v2786_v33 = vor.u32 %v3746_v25, %v2785_v24  ;;  %v2627_v52 = vld [vmem:[#allocation2 + $0xf8] sm:$0xf0] }
  0x6b   :  { %v2706_v1 = vor.u32 %v3726_v56, %v2705_v55  ;;  %v2657_v30 = vld [vmem:[#allocation2 + $0x128] sm:$0xf]  ;;  %v3714_v31 = vld [vmem:[#allocation2 + $0x134] sm:$0xf0]  ;;  %v2914_v38 = vor.u32 %v3778_v28, %v2913_v27  ;;  %v2630_v3 = vor.u32 %v3704_v51, %v2627_v52  ;;  %v2723_v27 = vld [vmem:[#allocation2 + $0x1b8] sm:$0xf0] }
  0x6c   :  { %1414 = vmatpush.bf16.msra.mxu0 %v2766_v4  ;;  %1427 = vmatpush.bf16.msra.mxu1 %v2894_v5  ;;  %v2562_v4 = vor.u32 %v3690_v61, %v2561_v59  ;;  %v2689_v5 = vld [vmem:[#allocation2 + $0x168] sm:$0xf]  ;;  %v3678_v35 = vld [vmem:[#allocation2 + $0x14] sm:$0xf0]  ;;  %v2658_v44 = vor.u32 %v3714_v31, %v2657_v30  ;;  %v3692_v30 = vld [vmem:[#allocation2 + $0x8c] sm:$0xf] }
  0x6d   :  { %v2690_v14 = vor.u32 %v3722_v6, %v2689_v5  ;;  %v3834_v37 = vld [vmem:[#allocation2 + $0x4f4] sm:$0xf0]  ;;  %v2769_v41 = vld [vmem:[#allocation2 + $0x208] sm:$0xf]  ;;  %v3700_v5 = vld [vmem:[#allocation2 + $0xcc] sm:$0xf] }
  0x6e   :  { %1452 = vmatpush.bf16.msrb.mxu2 %v3166_v0  ;;  %1440 = vmatpush.bf16.msra.mxu3 %v3022_v8  ;;  %v3754_v0 = vld [vmem:[#allocation2 + $0x274] sm:$0xf0]  ;;  %v2545_v8 = vld [vmem:[#allocation2 + $0x48] sm:$0xf]  ;;  %v2611_v6 = vld [vmem:[#allocation2 + $0xd8] sm:$0xf0] }
  0x6f   :  { %1415 = vmatmul.bf16.vlgmr.msra.gmra.mxu0 %v4134_v53  ;;  %1428 = vmatmul.bf16.vlgmr.msra.gmra.mxu1 %v4138_v60  ;;  %v2818_v7 = vor.u32 %v3754_v0, %v2817_v63  ;;  %v3742_v42 = vld [vmem:[#allocation2 + $0x214] sm:$0xf0]  ;;  %v3265_v56 = vld [vmem:[#allocation2 + $0x5e8] sm:$0xf]  ;;  %v3736_v0 = vld [vmem:[#allocation2 + $0x1ec] sm:$0xf] }
  0x70   :  { %1472 = vmatpush.bf16.msrb.mxu1 %v2626_v10  ;;  %1498 = vmatpush.bf16.msrb.mxu0 %v2882_v16  ;;  %v3686_v10 = vld [vmem:[#allocation2 + $0x54] sm:$0xf0]  ;;  %v2770_v55 = vor.u32 %v3742_v42, %v2769_v41  ;;  %v3121_v59 = vld [vmem:[#allocation2 + $0x4c8] sm:$0xf]  ;;  %v2579_v31 = vld [vmem:[#allocation2 + $0x98] sm:$0xf0] }
  0x71   :  { %1441 = vmatmul.bf16.vlgmr.msra.gmra.mxu3 %v4156_v34  ;;  %v3782_v16 = vld [vmem:[#allocation2 + $0x354] sm:$0xf0]  ;;  %v3089_v24 = vld [vmem:[#allocation2 + $0x488] sm:$0xf]  ;;  %v2707_v41 = vld [vmem:[#allocation2 + $0x198] sm:$0xf0]  ;;  %v2582_v42 = vor.u32 %v3692_v30, %v2579_v31 }
  0x72   :  { %1466 = vmatpush.bf16.msrb.mxu3 %v3278_v13  ;;  %1453 = vmatpush.bf16.msrb.mxu2 %v3150_v17  ;;  %v3750_v13 = vld [vmem:[#allocation2 + $0x254] sm:$0xf0]  ;;  %v2546_v17 = vor.u32 %v3686_v10, %v2545_v8  ;;  %v3249_v10 = vld [vmem:[#allocation2 + $0x5c8] sm:$0xf]  ;;  %v3011_v30 = vld [vmem:[#allocation2 + $0x3f8] sm:$0xf0] }
  0x73   :  { %v3774_v45 = vld [vmem:[#allocation2 + $0x314] sm:$0xf0]  ;;  %v3057_v51 = vld [vmem:[#allocation2 + $0x448] sm:$0xf] }
  0x74   :  { %1473 = vmatpush.bf16.msrb.mxu1 %v2610_v26  ;;  %1499 = vmatpush.bf16.msrb.mxu0 %v2866_v29  ;;  %v2674_v26 = vor.u32 %v3718_v19, %v2673_v18  ;;  %v2530_v29 = vor.u32 %v3682_v22, %v2529_v21  ;;  %v3870_v47 = vld [vmem:[#allocation2 + $0x614] sm:$0xf0]  ;;  %v3696_v18 = vld [vmem:[#allocation2 + $0xac] sm:$0xf]  ;;  %v2595_v19 = vld [vmem:[#allocation2 + $0xb8] sm:$0xf0] }
  0x75   :  { %1454 = vmatmul.bf16.vlgmr.msrb.gmra.mxu2 %v4158_v39  ;;  %v3233_v22 = vld [vmem:[#allocation2 + $0x5a8] sm:$0xf]  ;;  %v3822_v25 = vld [vmem:[#allocation2 + $0x494] sm:$0xf0]  ;;  %v2598_v28 = vor.u32 %v3696_v18, %v2595_v19  ;;  %v2659_v18 = vld [vmem:[#allocation2 + $0x138] sm:$0xf0] }
  0x76   :  { %1511 = vmatpush.bf16.msra.mxu2 %v3010_v20  ;;  %1485 = vmatpush.bf16.msra.mxu3 %v2754_v23  ;;  %v2802_v20 = vor.u32 %v3750_v13, %v2801_v12  ;;  %v2930_v23 = vor.u32 %v3782_v16, %v2929_v15  ;;  %v3105_v12 = vld [vmem:[#allocation2 + $0x4a8] sm:$0xf]  ;;  %v3826_v13 = vld [vmem:[#allocation2 + $0x4b4] sm:$0xf0]  ;;  %v2739_v15 = vld [vmem:[#allocation2 + $0x1d8] sm:$0xf0]  ;;  %v2614_v16 = vor.u32 %v3700_v5, %v2611_v6 }
  0x77   :  { %v3814_v52 = vld [vmem:[#allocation2 + $0x454] sm:$0xf0]  ;;  %v2675_v5 = vld [vmem:[#allocation2 + $0x158] sm:$0xf0] }
  0x78   :  { %1474 = vmatpush.bf16.msrb.mxu1 %v2594_v40  ;;  %1500 = vmatpush.bf16.msrb.mxu0 %v2850_v43  ;;  %v2641_v40 = vld [vmem:[#allocation2 + $0x108] sm:$0xf] }
  0x79   :  { %v2897_v43 = vld [vmem:[#allocation2 + $0x308] sm:$0xf] }
  0x7a   :  { %1512 = vmatpush.bf16.msra.mxu2 %v2994_v32  ;;  %1486 = vmatpush.bf16.msra.mxu3 %v2738_v36  ;;  %v2513_v32 = vld [vmem:[#allocation2 + $0x8] sm:$0xf]  ;;  %v2898_v61 = vor.u32 %v3774_v45, %v2897_v43  ;;  %v2563_v45 = vld [vmem:[#allocation2 + $0x78] sm:$0xf0] }
  0x7b   :  { %v3137_v36 = vld [vmem:[#allocation2 + $0x4e8] sm:$0xf]  ;;  %v2514_v49 = vor.u32 %v3678_v35, %v2513_v32  ;;  %v3090_v32 = vor.u32 %v3822_v25, %v3089_v24  ;;  %v3676_v24 = vld [vmem:[#allocation2 + $0xc] sm:$0xf]  ;;  %v2515_v25 = vld [vmem:[#allocation2 + $0x18] sm:$0xf0] }
  0x7c   :  { %1475 = vmatpush.bf16.msrb.mxu1 %v2578_v54  ;;  %1501 = vmatpush.bf16.msrb.mxu0 %v2834_v58  ;;  %v3138_v54 = vor.u32 %v3834_v37, %v3137_v36  ;;  %v3866_v58 = vld [vmem:[#allocation2 + $0x5f4] sm:$0xf0]  ;;  %v3217_v35 = vld [vmem:[#allocation2 + $0x588] sm:$0xf] }
  0x7d   :  { %v3854_v36 = vld [vmem:[#allocation2 + $0x594] sm:$0xf0]  ;;  %v3073_v37 = vld [vmem:[#allocation2 + $0x468] sm:$0xf] }
  0x7e   :  { %1513 = vmatpush.bf16.msra.mxu2 %v2978_v46  ;;  %1487 = vmatpush.bf16.msra.mxu3 %v2722_v50  ;;  %v3281_v46 = vld [vmem:[#allocation2 + $0x608] sm:$0xf]  ;;  %v3710_v50 = vld [vmem:[#allocation2 + $0x114] sm:$0xf0]  ;;  %v3218_v43 = vor.u32 %v3854_v36, %v3217_v35  ;;  %v3764_v35 = vld [vmem:[#allocation2 + $0x2cc] sm:$0xf]  ;;  %v2518_v36 = vor.u32 %v3676_v24, %v2515_v25 }
  0x7f   :  { %v3282_v63 = vor.u32 %v3870_v47, %v3281_v46  ;;  %v2642_v2 = vor.u32 %v3710_v50, %v2641_v40  ;;  %v3724_v40 = vld [vmem:[#allocation2 + $0x18c] sm:$0xf]  ;;  %v3850_v50 = vld [vmem:[#allocation2 + $0x574] sm:$0xf0] }
  0x80   :  { %1476 = vmatpush.bf16.msrb.mxu1 %v2562_v4  ;;  %1502 = vmatpush.bf16.msrb.mxu0 %v2818_v7  ;;  %v3266_v4 = vor.u32 %v3866_v58, %v3265_v56  ;;  %v2710_v47 = vor.u32 %v3724_v40, %v2707_v41  ;;  %v2643_v40 = vld [vmem:[#allocation2 + $0x118] sm:$0xf0]  ;;  %v3784_v24 = vld [vmem:[#allocation2 + $0x36c] sm:$0xf] }
  0x81   :  { %3288 = vmatmul.msk.bf16.vlgmr.msrb.gmra.mxu3 %vm1286_vm0, %v4149_v48 }
  0x82   :  { %1514 = vmatpush.bf16.msra.mxu2 %v2962_v62  ;;  %1488 = vmatpush.bf16.msra.mxu3 %v2706_v1  ;;  %v3830_v62 = vld [vmem:[#allocation2 + $0x4d4] sm:$0xf0]  ;;  %v2755_v1 = vld [vmem:[#allocation2 + $0x1f8] sm:$0xf0] }
  0x83   :  { %v3122_v7 = vor.u32 %v3830_v62, %v3121_v59  ;;  %v2758_v8 = vor.u32 %v3736_v0, %v2755_v1  ;;  %v3684_v59 = vld [vmem:[#allocation2 + $0x4c] sm:$0xf]  ;;  %v3058_v62 = vor.u32 %v3814_v52, %v3057_v51  ;;  %v3185_v0 = vld [vmem:[#allocation2 + $0x548] sm:$0xf]  ;;  %v3846_v1 = vld [vmem:[#allocation2 + $0x554] sm:$0xf0] }
  0x84   :  { %1477 = vmatpush.bf16.msrb.mxu1 %v2546_v17  ;;  %1503 = vmatpush.bf16.msrb.mxu0 %v2802_v20  ;;  %v3106_v20 = vor.u32 %v3826_v13, %v3105_v12  ;;  %v3169_v13 = vld [vmem:[#allocation2 + $0x528] sm:$0xf]  ;;  %v3828_v51 = vld [vmem:[#allocation2 + $0x4cc] sm:$0xf]  ;;  %v3123_v52 = vld [vmem:[#allocation2 + $0x4d8] sm:$0xf0] }
  0x86   :  { %1515 = vmatpush.bf16.msra.mxu2 %v2946_v11  ;;  %1489 = vmatpush.bf16.msra.mxu3 %v2690_v14  ;;  %v3862_v11 = vld [vmem:[#allocation2 + $0x5d4] sm:$0xf0]  ;;  %v3732_v14 = vld [vmem:[#allocation2 + $0x1cc] sm:$0xf] }
  0x87   :  { %v3250_v17 = vor.u32 %v3862_v11, %v3249_v10  ;;  %v2742_v21 = vor.u32 %v3732_v14, %v2739_v15  ;;  %v2531_v10 = vld [vmem:[#allocation2 + $0x38] sm:$0xf0]  ;;  %v3842_v14 = vld [vmem:[#allocation2 + $0x534] sm:$0xf0]  ;;  %v3025_v15 = vld [vmem:[#allocation2 + $0x408] sm:$0xf] }
  0x88   :  { %1478 = vmatpush.bf16.msrb.mxu1 %v2530_v29  ;;  %1504 = vmatpush.bf16.msrb.mxu0 %v2786_v33 }
  0x8a   :  { %1516 = vmatpush.bf16.msra.mxu2 %v2930_v23  ;;  %1490 = vmatpush.bf16.msra.mxu3 %v2674_v26  ;;  %v3858_v23 = vld [vmem:[#allocation2 + $0x5b4] sm:$0xf0]  ;;  %v3728_v26 = vld [vmem:[#allocation2 + $0x1ac] sm:$0xf] }
  0x8b   :  { %v3234_v29 = vor.u32 %v3858_v23, %v3233_v22  ;;  %v2726_v33 = vor.u32 %v3728_v26, %v2723_v27  ;;  %v3170_v22 = vor.u32 %v3842_v14, %v3169_v13  ;;  %v3153_v23 = vld [vmem:[#allocation2 + $0x508] sm:$0xf]  ;;  %v2963_v14 = vld [vmem:[#allocation2 + $0x398] sm:$0xf0] }
  0x8c   :  { %1479 = vmatpush.bf16.msrb.mxu1 %v2514_v49  ;;  %1505 = vmatpush.bf16.msrb.mxu0 %v2770_v55  ;;  %v3201_v49 = vld [vmem:[#allocation2 + $0x568] sm:$0xf]  ;;  %v2691_v55 = vld [vmem:[#allocation2 + $0x178] sm:$0xf0] }
  0x8d   :  { %v3202_v58 = vor.u32 %v3850_v50, %v3201_v49  ;;  %v2995_v50 = vld [vmem:[#allocation2 + $0x3d8] sm:$0xf0] }
  0x8e   :  { %1517 = vmatpush.bf16.msra.mxu2 %v2914_v38  ;;  %1491 = vmatpush.bf16.msra.mxu3 %v2658_v44  ;;  %v3818_v38 = vld [vmem:[#allocation2 + $0x474] sm:$0xf0]  ;;  %v3688_v44 = vld [vmem:[#allocation2 + $0x6c] sm:$0xf] }
  0x8f   :  { %1506 = vmatmul.bf16.vlgmr.msrb.gmra.mxu0 %v4134_v53  ;;  %1480 = vmatmul.bf16.vlgmr.msrb.gmra.mxu1 %v4136_v57  ;;  %v3074_v46 = vor.u32 %v3818_v38, %v3073_v37  ;;  %v2566_v56 = vor.u32 %v3688_v44, %v2563_v45  ;;  %v2867_v37 = vld [vmem:[#allocation2 + $0x2d8] sm:$0xf0]  ;;  %v3708_v38 = vld [vmem:[#allocation2 + $0x10c] sm:$0xf] }
  0x90   :  { %1524 = vmatpush.bf16.msra.mxu1 %v3138_v54  ;;  %1557 = vmatpush.bf16.msra.mxu0 %v3282_v63  ;;  %v3720_v54 = vld [vmem:[#allocation2 + $0x16c] sm:$0xf]  ;;  %v2646_v49 = vor.u32 %v3708_v38, %v2643_v40 }
  0x91   :  { %v2694_v63 = vor.u32 %v3720_v54, %v2691_v55  ;;  %v3760_v55 = vld [vmem:[#allocation2 + $0x2ac] sm:$0xf] }
  0x92   :  { %1518 = vmatpush.bf16.msra.mxu2 %v2898_v61  ;;  %1492 = vmatpush.bf16.msra.mxu3 %v2642_v2  ;;  %v2547_v61 = vld [vmem:[#allocation2 + $0x58] sm:$0xf0]  ;;  %v3041_v2 = vld [vmem:[#allocation2 + $0x428] sm:$0xf]  ;;  %v3780_v38 = vld [vmem:[#allocation2 + $0x34c] sm:$0xf] }
  0x93   :  { %v2550_v6 = vor.u32 %v3684_v59, %v2547_v61  ;;  %v3251_v59 = vld [vmem:[#allocation2 + $0x5d8] sm:$0xf0] }
  0x94   :  { %1525 = vmatpush.bf16.msra.mxu1 %v3122_v7  ;;  %1576 = vmatpush.bf16.msrb.mxu0 %v2758_v8  ;;  %v3186_v7 = vor.u32 %v3846_v1, %v3185_v0  ;;  %v3680_v8 = vld [vmem:[#allocation2 + $0x2c] sm:$0xf]  ;;  %v2979_v1 = vld [vmem:[#allocation2 + $0x3b8] sm:$0xf0] }
  0x95   :  { %1493 = vmatmul.bf16.vlgmr.msra.gmra.mxu3 %v4142_v9  ;;  %1519 = vmatmul.bf16.vlgmr.msra.gmra.mxu2 %v4138_v60  ;;  %v2534_v19 = vor.u32 %v3680_v8, %v2531_v10  ;;  %v3235_v8 = vld [vmem:[#allocation2 + $0x5b8] sm:$0xf0] }
  0x96   :  { %1563 = vmatpush.bf16.msrb.mxu2 %v2630_v3  ;;  %1537 = vmatpush.bf16.msrb.mxu3 %v3266_v4  ;;  %v3810_v3 = vld [vmem:[#allocation2 + $0x434] sm:$0xf0]  ;;  %v3716_v4 = vld [vmem:[#allocation2 + $0x14c] sm:$0xf] }
  0x97   :  { %v3042_v11 = vor.u32 %v3810_v3, %v3041_v2  ;;  %v2678_v12 = vor.u32 %v3716_v4, %v2675_v5  ;;  %v3824_v2 = vld [vmem:[#allocation2 + $0x4ac] sm:$0xf]  ;;  %v3107_v3 = vld [vmem:[#allocation2 + $0x4b8] sm:$0xf0] }
  0x98   :  { %1526 = vmatpush.bf16.msra.mxu1 %v3106_v20  ;;  %1577 = vmatpush.bf16.msrb.mxu0 %v2742_v21  ;;  %v3768_v20 = vld [vmem:[#allocation2 + $0x2ec] sm:$0xf]  ;;  %v2883_v21 = vld [vmem:[#allocation2 + $0x2f8] sm:$0xf0] }
  0x99   :  { %v2886_v31 = vor.u32 %v3768_v20, %v2883_v21  ;;  %v3756_v5 = vld [vmem:[#allocation2 + $0x28c] sm:$0xf]  ;;  %v3219_v21 = vld [vmem:[#allocation2 + $0x598] sm:$0xf0] }
  0x9a   :  { %1564 = vmatpush.bf16.msrb.mxu2 %v2614_v16  ;;  %1538 = vmatpush.bf16.msrb.mxu3 %v3250_v17  ;;  %v3806_v16 = vld [vmem:[#allocation2 + $0x414] sm:$0xf0]  ;;  %v3712_v17 = vld [vmem:[#allocation2 + $0x12c] sm:$0xf] }
  0x9b   :  { %v3026_v26 = vor.u32 %v3806_v16, %v3025_v15  ;;  %v2662_v27 = vor.u32 %v3712_v17, %v2659_v18  ;;  %v3820_v15 = vld [vmem:[#allocation2 + $0x48c] sm:$0xf]  ;;  %v3091_v16 = vld [vmem:[#allocation2 + $0x498] sm:$0xf0] }
  0x9c   :  { %1527 = vmatpush.bf16.msra.mxu1 %v3090_v32  ;;  %1578 = vmatpush.bf16.msrb.mxu0 %v2726_v33  ;;  %v3832_v32 = vld [vmem:[#allocation2 + $0x4ec] sm:$0xf]  ;;  %v3139_v33 = vld [vmem:[#allocation2 + $0x4f8] sm:$0xf0] }
  0x9d   :  { %v3142_v45 = vor.u32 %v3832_v32, %v3139_v33  ;;  %v3752_v18 = vld [vmem:[#allocation2 + $0x26c] sm:$0xf]  ;;  %v3203_v33 = vld [vmem:[#allocation2 + $0x578] sm:$0xf0] }
  0x9e   :  { %1565 = vmatpush.bf16.msrb.mxu2 %v2598_v28  ;;  %1539 = vmatpush.bf16.msrb.mxu3 %v3234_v29  ;;  %v3838_v28 = vld [vmem:[#allocation2 + $0x514] sm:$0xf0]  ;;  %v3800_v29 = vld [vmem:[#allocation2 + $0x3ec] sm:$0xf] }
  0x9f   :  { %3289 = vmatmul.msk.bf16.vlgmr.msra.gmra.mxu0 %vm1286_vm0, %v4149_v48  ;;  %v3154_v41 = vor.u32 %v3838_v28, %v3153_v23  ;;  %v3014_v44 = vor.u32 %v3800_v29, %v3011_v30  ;;  %v3094_v23 = vor.u32 %v3820_v15, %v3091_v16  ;;  %v3075_v28 = vld [vmem:[#allocation2 + $0x478] sm:$0xf0]  ;;  %v3748_v30 = vld [vmem:[#allocation2 + $0x24c] sm:$0xf] }
  0xa0   :  { %1528 = vmatpush.bf16.msra.mxu1 %v3074_v46  ;;  %1579 = vmatpush.bf16.msrb.mxu0 %v2710_v47  ;;  %v3796_v46 = vld [vmem:[#allocation2 + $0x3cc] sm:$0xf]  ;;  %v2870_v47 = vor.u32 %v3764_v35, %v2867_v37  ;;  %v3027_v15 = vld [vmem:[#allocation2 + $0x418] sm:$0xf0] }
  0xa1   :  { %v2998_v61 = vor.u32 %v3796_v46, %v2995_v50  ;;  %v3848_v32 = vld [vmem:[#allocation2 + $0x56c] sm:$0xf] }
  0xa2   :  { %1566 = vmatpush.bf16.msrb.mxu2 %v2582_v42  ;;  %1540 = vmatpush.bf16.msrb.mxu3 %v3218_v43  ;;  %v3864_v42 = vld [vmem:[#allocation2 + $0x5ec] sm:$0xf]  ;;  %v3267_v43 = vld [vmem:[#allocation2 + $0x5f8] sm:$0xf0] }
  0xa3   :  { %v3270_v54 = vor.u32 %v3864_v42, %v3267_v43  ;;  %v2931_v42 = vld [vmem:[#allocation2 + $0x358] sm:$0xf0]  ;;  %v3812_v43 = vld [vmem:[#allocation2 + $0x44c] sm:$0xf] }
  0xa4   :  { %1529 = vmatpush.bf16.msra.mxu1 %v3058_v62  ;;  %1580 = vmatpush.bf16.msrb.mxu0 %v2694_v63  ;;  %v3126_v62 = vor.u32 %v3828_v51, %v3123_v52  ;;  %v3792_v63 = vld [vmem:[#allocation2 + $0x3ac] sm:$0xf]  ;;  %v3187_v51 = vld [vmem:[#allocation2 + $0x558] sm:$0xf0]  ;;  %v2934_v52 = vor.u32 %v3780_v38, %v2931_v42  ;;  %v3333_v42 = vld [vmem:[#allocation5 + $0x50] sm:$0xf] }
  0xa5   :  { %v2982_v10 = vor.u32 %v3792_v63, %v2979_v1  ;;  %v3744_v46 = vld [vmem:[#allocation2 + $0x22c] sm:$0xf] }
  0xa6   :  { %1567 = vmatpush.bf16.msrb.mxu2 %v2566_v56  ;;  %1541 = vmatpush.bf16.msrb.mxu3 %v3202_v58  ;;  %v2851_v56 = vld [vmem:[#allocation2 + $0x2b8] sm:$0xf0]  ;;  %v3860_v58 = vld [vmem:[#allocation2 + $0x5cc] sm:$0xf] }
  0xa7   :  { %v2854_v0 = vor.u32 %v3760_v55, %v2851_v56  ;;  %v3254_v4 = vor.u32 %v3860_v58, %v3251_v59  ;;  %v3844_v50 = vld [vmem:[#allocation2 + $0x54c] sm:$0xf]  ;;  %v2915_v58 = vld [vmem:[#allocation2 + $0x338] sm:$0xf0] }
  0xa8   :  { %1530 = vmatpush.bf16.msra.mxu1 %v3042_v11  ;;  %1581 = vmatpush.bf16.msrb.mxu0 %v2678_v12  ;;  %v3110_v11 = vor.u32 %v3824_v2, %v3107_v3  ;;  %v3788_v12 = vld [vmem:[#allocation2 + $0x38c] sm:$0xf]  ;;  %v3171_v3 = vld [vmem:[#allocation2 + $0x538] sm:$0xf0] }
  0xa9   :  { %v3776_v55 = vld [vmem:[#allocation2 + $0x32c] sm:$0xf] }
  0xaa   :  { %1568 = vmatpush.bf16.msrb.mxu2 %v2550_v6  ;;  %1542 = vmatpush.bf16.msrb.mxu3 %v3186_v7  ;;  %v2835_v6 = vld [vmem:[#allocation2 + $0x298] sm:$0xf0]  ;;  %v3856_v7 = vld [vmem:[#allocation2 + $0x5ac] sm:$0xf] }
  0xab   :  { %v2838_v13 = vor.u32 %v3756_v5, %v2835_v6  ;;  %v3238_v17 = vor.u32 %v3856_v7, %v3235_v8  ;;  %v3808_v59 = vld [vmem:[#allocation2 + $0x42c] sm:$0xf]  ;;  %v3283_v5 = vld [vmem:[#allocation2 + $0x618] sm:$0xf0]  ;;  %v4191_v6 = vld [vmem:[%s4333_s2] sm:$0xf]  ;;  %v2918_v8 = vor.u32 %v3776_v55, %v2915_v58 }
  0xac   :  { %1531 = vmatpush.bf16.msra.mxu1 %v3026_v26  ;;  %1582 = vmatpush.bf16.msrb.mxu0 %v2662_v27  ;;  %v2947_v26 = vld [vmem:[#allocation2 + $0x378] sm:$0xf0]  ;;  %v3816_v27 = vld [vmem:[#allocation2 + $0x46c] sm:$0xf] }
  0xad   :  { %v3078_v37 = vor.u32 %v3816_v27, %v3075_v28  ;;  %v3740_v63 = vld [vmem:[#allocation2 + $0x20c] sm:$0xf] }
  0xae   :  { %1569 = vmatpush.bf16.msrb.mxu2 %v2534_v19  ;;  %1543 = vmatpush.bf16.msrb.mxu3 %v3170_v22  ;;  %v2819_v19 = vld [vmem:[#allocation2 + $0x278] sm:$0xf0]  ;;  %v2966_v22 = vor.u32 %v3788_v12, %v2963_v14  ;;  %v3840_v1 = vld [vmem:[#allocation2 + $0x52c] sm:$0xf] }
  0xaf   :  { %1532 = vmatmul.bf16.vlgmr.msra.gmra.mxu1 %v4156_v34  ;;  %v2822_v25 = vor.u32 %v3752_v18, %v2819_v19  ;;  %v3804_v14 = vld [vmem:[#allocation2 + $0x40c] sm:$0xf]  ;;  %v3349_v19 = vld [vmem:[#allocation5 + $0x70] sm:$0xf] }
  0xb0   :  { %1589 = vmatpush.bf16.msrb.mxu1 %v2886_v31  ;;  %1583 = vmatpush.bf16.msrb.mxu0 %v2646_v49  ;;  %v4180_v20 = vpop.f32.mrf.mxu0  ;;  %v4182_v29 = vpop.f32.mrf.mxu1  ;;  %v2803_v31 = vld [vmem:[#allocation2 + $0x258] sm:$0xf0]  ;;  %v3030_v27 = vor.u32 %v3804_v14, %v3027_v15  ;;  %v3365_v15 = vld [vmem:[#allocation5 + $0x90] sm:$0xf] }
  0xb1   :  { %v2806_v40 = vor.u32 %v3748_v30, %v2803_v31  ;;  %v3341_v30 = vld [vmem:[#allocation5 + $0x60] sm:$0xf]  ;;  %v3884_v31 = vld [vmem:[#allocation5 + $0x64] sm:$0xf0] }
  0xb2   :  { %1570 = vmatpush.bf16.msrb.mxu2 %v2518_v36  ;;  %1544 = vmatpush.bf16.msrb.mxu3 %v3154_v41  ;;  %v2950_v36 = vor.u32 %v3784_v24, %v2947_v26  ;;  %v3902_v24 = vld [vmem:[#allocation5 + $0xf4] sm:$0xf0] }
  0xb3   :  { %1584 = vmatmul.bf16.vlgmr.msrb.gmra.mxu0 %v4142_v9  ;;  %v4184_v35 = vpop.f32.mrf.mxu2 }
  0xb4   :  { %1590 = vmatpush.bf16.msrb.mxu1 %v2870_v47  ;;  %1628 = vmatpush.bf16.msra.mxu0 %v3270_v54  ;;  %v4186_v41 = vpop.f32.mrf.mxu3  ;;  %v2787_v47 = vld [vmem:[#allocation2 + $0x238] sm:$0xf0] }
  0xb5   :  { %1545 = vmatmul.bf16.vlgmr.msrb.gmra.mxu3 %v4158_v39  ;;  %1571 = vmatmul.bf16.vlgmr.msrb.gmra.mxu2 %v4136_v57  ;;  %v3852_v57 = vld [vmem:[#allocation2 + $0x58c] sm:$0xf]  ;;  %v2790_v56 = vor.u32 %v3744_v46, %v2787_v47  ;;  %v3898_v46 = vld [vmem:[#allocation5 + $0xd4] sm:$0xf0] }
  0xb6   :  { %1602 = vmatpush.bf16.msra.mxu3 %v3014_v44  ;;  %1615 = vmatpush.bf16.msra.mxu2 %v3142_v45  ;;  %v3222_v9 = vor.u32 %v3852_v57, %v3219_v21  ;;  %v3059_v44 = vld [vmem:[#allocation2 + $0x458] sm:$0xf0]  ;;  %v3206_v45 = vor.u32 %v3848_v32, %v3203_v33  ;;  %v3886_v57 = vld [vmem:[#allocation5 + $0x74] sm:$0xf0]  ;;  %v3836_v21 = vld [vmem:[#allocation2 + $0x50c] sm:$0xf] }
  0xb7   :  { %v3062_v54 = vor.u32 %v3812_v43, %v3059_v44  ;;  %v3350_v28 = vor.u32 %v3886_v57, %v3349_v19  ;;  %v3405_v33 = vld [vmem:[#allocation5 + $0xe0] sm:$0xf]  ;;  %v3882_v43 = vld [vmem:[#allocation5 + $0x54] sm:$0xf0]  ;;  %v3872_v57 = vld [vmem:[#allocation5 + $0x4] sm:$0xf0] }
  0xb8   :  { %1591 = vmatpush.bf16.msrb.mxu1 %v2854_v0  ;;  %1629 = vmatpush.bf16.msra.mxu0 %v3254_v4  ;;  %v1301_v49 = vpop.f32.mrf.mxu0  ;;  %v2771_v0 = vld [vmem:[#allocation2 + $0x218] sm:$0xf0]  ;;  %v1314_v2 = vpop.f32.mrf.mxu1  ;;  %v3868_v4 = vld [vmem:[#allocation2 + $0x60c] sm:$0xf]  ;;  %v3293_v19 = vld [vmem:[#allocation5] sm:$0xf] }
  0xb9   :  { %v2774_v12 = vor.u32 %v3740_v63, %v2771_v0  ;;  %v3286_v18 = vor.u32 %v3868_v4, %v3283_v5  ;;  %v3880_v49 = vld [vmem:[#allocation5 + $0x44] sm:$0xf0]  ;;  %v3373_v5 = vld [vmem:[#allocation5 + $0xa0] sm:$0xf] }
  0xba   :  { %1603 = vmatpush.bf16.msra.mxu3 %v2998_v61  ;;  %1616 = vmatpush.bf16.msra.mxu2 %v3126_v62  ;;  %v3043_v61 = vld [vmem:[#allocation2 + $0x438] sm:$0xf0]  ;;  %v3190_v62 = vor.u32 %v3844_v50, %v3187_v51  ;;  %v3876_v2 = vld [vmem:[#allocation5 + $0x24] sm:$0xf0] }
  0xbb   :  { %v1327_v7 = vpop.f32.mrf.mxu2 }
  0xbc   :  { %1592 = vmatpush.bf16.msrb.mxu1 %v2838_v13  ;;  %1630 = vmatpush.bf16.msra.mxu0 %v3238_v17  ;;  %v2899_v13 = vld [vmem:[#allocation2 + $0x318] sm:$0xf0]  ;;  %v1340_v16 = vpop.f32.mrf.mxu3  ;;  %v3174_v17 = vor.u32 %v3840_v1, %v3171_v3  ;;  %v3309_v1 = vld [vmem:[#allocation5 + $0x20] sm:$0xf]  ;;  %v3892_v7 = vld [vmem:[#allocation5 + $0xa4] sm:$0xf0] }
  0xbd   :  { %v3374_v14 = vor.u32 %v3892_v7, %v3373_v5  ;;  %v3890_v16 = vld [vmem:[#allocation5 + $0x94] sm:$0xf0]  ;;  %v3875_v7 = vld [vmem:[#allocation5 + $0x24] sm:$0xf] }
  0xbe   :  { %1604 = vmatpush.bf16.msra.mxu3 %v2982_v10  ;;  %1617 = vmatpush.bf16.msra.mxu2 %v3110_v11  ;;  %v3046_v10 = vor.u32 %v3808_v59, %v3043_v61  ;;  %v3772_v11 = vld [vmem:[#allocation2 + $0x30c] sm:$0xf]  ;;  %v3878_v59 = vld [vmem:[#allocation5 + $0x34] sm:$0xf0]  ;;  %v3381_v61 = vld [vmem:[#allocation5 + $0xb0] sm:$0xf] }
  0xbf   :  { %v2902_v26 = vor.u32 %v3772_v11, %v2899_v13  ;;  %v3874_v13 = vld [vmem:[#allocation5 + $0x14] sm:$0xf0] }
  0xc0   :  { %1593 = vmatpush.bf16.msrb.mxu1 %v2822_v25  ;;  %1631 = vmatpush.bf16.msra.mxu0 %v3222_v9  ;;  %v274_v25 = vperm.slane %v4191_v6, 0 }
  0xc2   :  { %1605 = vmatpush.bf16.msra.mxu3 %v2966_v22  ;;  %1618 = vmatpush.bf16.msra.mxu2 %v3094_v23  ;;  %v3155_v22 = vld [vmem:[#allocation2 + $0x518] sm:$0xf0]  ;;  %v3413_v23 = vld [vmem:[#allocation5 + $0xf0] sm:$0xf] }
  0xc3   :  { %v3158_v9 = vor.u32 %v3836_v21, %v3155_v22  ;;  %v3414_v32 = vor.u32 %v3902_v24, %v3413_v23  ;;  %v3885_v21 = vld [vmem:[#allocation5 + $0x74] sm:$0xf]  ;;  %v3351_v23 = vld [vmem:[#allocation5 + $0x78] sm:$0xf0]  ;;  %v3357_v24 = vld [vmem:[#allocation5 + $0x80] sm:$0xf] }
  0xc4   :  { %1594 = vmatpush.bf16.msrb.mxu1 %v2806_v40  ;;  %1632 = vmatpush.bf16.msra.mxu0 %v3206_v45  ;;  %v1377_v38 = vpop.f32.mrf.mxu2  ;;  %v3342_v40 = vor.u32 %v3884_v31, %v3341_v30  ;;  %v3397_v45 = vld [vmem:[#allocation5 + $0xd0] sm:$0xf]  ;;  %v3354_v31 = vor.u32 %v3885_v21, %v3351_v23  ;;  %v3873_v21 = vld [vmem:[#allocation5 + $0x14] sm:$0xf] }
  0xc5   :  { %v3398_v50 = vor.u32 %v3898_v46, %v3397_v45  ;;  %v3335_v45 = vld [vmem:[#allocation5 + $0x58] sm:$0xf0]  ;;  %v3889_v23 = vld [vmem:[#allocation5 + $0x94] sm:$0xf] }
  0xc6   :  { %1606 = vmatpush.bf16.msra.mxu3 %v2950_v36  ;;  %1619 = vmatpush.bf16.msra.mxu2 %v3078_v37  ;;  %v3900_v36 = vld [vmem:[#allocation5 + $0xe4] sm:$0xf0]  ;;  %v1300_v37 = vadd.f32 %v4180_v20, %v274_v25  ;;  %v3325_v20 = vld [vmem:[#allocation5 + $0x40] sm:$0xf] }
  0xc7   :  { %v3406_v44 = vor.u32 %v3900_v36, %v3405_v33  ;;  %v3326_v58 = vor.u32 %v3880_v49, %v3325_v20  ;;  %v3888_v25 = vld [vmem:[#allocation5 + $0x84] sm:$0xf0]  ;;  %v3883_v33 = vld [vmem:[#allocation5 + $0x64] sm:$0xf]  ;;  %v3343_v36 = vld [vmem:[#allocation5 + $0x68] sm:$0xf0] }
  0xc8   :  { %1595 = vmatpush.bf16.msrb.mxu1 %v2790_v56  ;;  %1633 = vmatpush.bf16.msra.mxu0 %v3190_v62  ;;  %v1313_v47 = vadd.f32 %v4182_v29, %v1300_v37  ;;  %v3317_v29 = vld [vmem:[#allocation5 + $0x30] sm:$0xf]  ;;  %v3879_v49 = vld [vmem:[#allocation5 + $0x44] sm:$0xf] }
  0xc9   :  { %v3318_v63 = vor.u32 %v3878_v59, %v3317_v29  ;;  %v3469_v29 = vld [vmem:[#allocation5 + $0x160] sm:$0xf]  ;;  %v3916_v59 = vld [vmem:[#allocation5 + $0x164] sm:$0xf0] }
  0xca   :  { %1607 = vmatpush.bf16.msra.mxu3 %v2934_v52  ;;  %1620 = vmatpush.bf16.msra.mxu2 %v3062_v54  ;;  %v3389_v52 = vld [vmem:[#allocation5 + $0xc0] sm:$0xf]  ;;  %v3896_v54 = vld [vmem:[#allocation5 + $0xc4] sm:$0xf0]  ;;  %v1326_v55 = vadd.f32 %v4184_v35, %v1313_v47  ;;  %v3897_v47 = vld [vmem:[#allocation5 + $0xd4] sm:$0xf] }
  0xcc   :  { %1596 = vmatpush.bf16.msrb.mxu1 %v2774_v12  ;;  %1634 = vmatpush.bf16.msra.mxu0 %v3174_v17  ;;  %v1351_v51 = vpop.f32.mrf.mxu0  ;;  %v1379_v56 = vpop.f32.mrf.mxu2  ;;  %v1339_v62 = vadd.f32 %v4186_v41, %v1326_v55  ;;  %v3301_v12 = vld [vmem:[#allocation5 + $0x10] sm:$0xf] }
  0xcd   :  { %v3302_v17 = vor.u32 %v3874_v13, %v3301_v12  ;;  %v3477_v55 = vld [vmem:[#allocation5 + $0x170] sm:$0xf]  ;;  %v3375_v13 = vld [vmem:[#allocation5 + $0xa8] sm:$0xf0] }
  0xce   :  { %1608 = vmatpush.bf16.msra.mxu3 %v2918_v8  ;;  %1621 = vmatpush.bf16.msra.mxu2 %v3046_v10  ;;  %v1352_v0 = vadd.f32 %v1351_v51, %v1339_v62  ;;  %v3310_v10 = vor.u32 %v3876_v2, %v3309_v1  ;;  %v3877_v62 = vld [vmem:[#allocation5 + $0x34] sm:$0xf]  ;;  %v3470_v1 = vor.u32 %v3916_v59, %v3469_v29  ;;  %v3904_v29 = vld [vmem:[#allocation5 + $0x104] sm:$0xf0] }
  0xcf   :  { %1597 = vmatmul.bf16.vlgmr.msrb.gmra.mxu1 %v4134_v53  ;;  %v3334_v53 = vor.u32 %v3882_v43, %v3333_v42  ;;  %v3346_v43 = vor.u32 %v3883_v33, %v3343_v36  ;;  %v3893_v2 = vld [vmem:[#allocation5 + $0xb4] sm:$0xf]  ;;  %v3887_v33 = vld [vmem:[#allocation5 + $0x84] sm:$0xf]  ;;  %v3910_v36 = vld [vmem:[#allocation5 + $0x134] sm:$0xf0] }
  0xd0   :  { %1648 = vmatpush.bf16.msra.mxu1 %v3286_v18  ;;  %1635 = vmatpush.bf16.msra.mxu0 %v3158_v9 }
  0xd2   :  { %1609 = vmatpush.bf16.msra.mxu3 %v2902_v26  ;;  %1622 = vmatpush.bf16.msra.mxu2 %v3030_v27  ;;  %v3901_v26 = vld [vmem:[#allocation5 + $0xf4] sm:$0xf]  ;;  %v3415_v27 = vld [vmem:[#allocation5 + $0xf8] sm:$0xf0] }
  0xd3   :  { %1636 = vmatmul.bf16.vlgmr.msra.gmra.mxu0 %v4158_v39  ;;  %v3894_v39 = vld [vmem:[#allocation5 + $0xb4] sm:$0xf0]  ;;  %v3418_v37 = vor.u32 %v3901_v26, %v3415_v27  ;;  %v3912_v26 = vld [vmem:[#allocation5 + $0x144] sm:$0xf0] }
  0xd4   :  { %2065 = vmatpush.bf16.msrb.mxu1 %v3414_v32  ;;  %v3382_v3 = vor.u32 %v3894_v39, %v3381_v61  ;;  %v4202_v35 = vpop.f32.mrf.mxu3  ;;  %v1353_v4 = vpop.f32.mrf.mxu0  ;;  %v3358_v32 = vor.u32 %v3888_v25, %v3357_v24  ;;  %v275_v61 = vperm.slane %v4191_v6, 1  ;;  %v3367_v24 = vld [vmem:[#allocation5 + $0x98] sm:$0xf0]  ;;  %v3453_v25 = vld [vmem:[#allocation5 + $0x140] sm:$0xf] }
  0xd5   :  { %1610 = vmatmul.bf16.vlgmr.msra.gmra.mxu3 %v4138_v60  ;;  %1623 = vmatmul.bf16.vlgmr.msra.gmra.mxu2 %v4156_v34  ;;  %v1364_v60 = vpop.f32.mrf.mxu1  ;;  %v3390_v34 = vor.u32 %v3896_v54, %v3389_v52  ;;  %v3895_v52 = vld [vmem:[#allocation5 + $0xc4] sm:$0xf]  ;;  %v3391_v54 = vld [vmem:[#allocation5 + $0xc8] sm:$0xf0] }
  0xd6   :  { %2052 = vmatpush.bf16.msrb.mxu3 %v3350_v28  ;;  %v1365_v41 = vadd.f32 %v1364_v60, %v1352_v0  ;;  %v3294_v28 = vor.u32 %v3872_v57, %v3293_v19  ;;  %v3918_v60 = vld [vmem:[#allocation5 + $0x174] sm:$0xf0]  ;;  %v3394_v0 = vor.u32 %v3895_v52, %v3391_v54  ;;  %v1391_v5 = vadd.f32 %v4202_v35, %v275_v61  ;;  %v3917_v61 = vld [vmem:[#allocation5 + $0x174] sm:$0xf] }
  0xd8   :  { %2066 = vmatpush.bf16.msrb.mxu1 %v3406_v44  ;;  %v4206_v11 = vpop.f32.mrf.mxu2  ;;  %v1378_v18 = vadd.f32 %v1377_v38, %v1365_v41  ;;  %v3899_v38 = vld [vmem:[#allocation5 + $0xe4] sm:$0xf]  ;;  %v3881_v44 = vld [vmem:[#allocation5 + $0x54] sm:$0xf] }
  0xd9   :  { %v3338_v20 = vor.u32 %v3881_v44, %v3335_v45  ;;  %v3891_v41 = vld [vmem:[#allocation5 + $0xa4] sm:$0xf]  ;;  %v1404_v57 = vadd.f32 %v4206_v11, %v1391_v5  ;;  %v3445_v11 = vld [vmem:[#allocation5 + $0x130] sm:$0xf]  ;;  %v3908_v44 = vld [vmem:[#allocation5 + $0x124] sm:$0xf0] }
  0xda   :  { %2053 = vmatpush.bf16.msrb.mxu3 %v3342_v40  ;;  %v1654_v30 = vmax.f32 %v1378_v18, 0.0  ;;  %v3407_v40 = vld [vmem:[#allocation5 + $0xe8] sm:$0xf0] }
  0xdb   :  { %v3410_v46 = vor.u32 %v3899_v38, %v3407_v40  ;;  %v3359_v38 = vld [vmem:[#allocation5 + $0x88] sm:$0xf0]  ;;  %v3446_v40 = vor.u32 %v3910_v36, %v3445_v11 }
  0xdc   :  { %2067 = vmatpush.bf16.msrb.mxu1 %v3398_v50  ;;  %v1392_v22 = vpop.f32.mrf.mxu3  ;;  %v4208_v42 = vpack.c.bf16 %v1654_v30, %v1654_v30  ;;  %v3327_v50 = vld [vmem:[#allocation5 + $0x48] sm:$0xf0]  ;;  %v3871_v30 = vld [vmem:[#allocation5 + $0x4] sm:$0xf] }
  0xdd   :  { %v1366_v8 = vpop.f32.mrf.mxu1  ;;  %v3378_v22 = vor.u32 %v3891_v41, %v3375_v13  ;;  %v3932_v13 = vld [vmem:[#allocation5 + $0x1e4] sm:$0xf0] }
  0xde   :  { %2054 = vmatpush.bf16.msrb.mxu3 %v3334_v53  ;;  %v3399_v53 = vld [vmem:[#allocation5 + $0xd8] sm:$0xf0]  ;;  %v3311_v8 = vld [vmem:[#allocation5 + $0x28] sm:$0xf0] }
  0xdf   :  { %3290 = vmatmul.msk.bf16.vlgmr.msra.gmra.mxu1 %vm1286_vm0, %v4149_v48  ;;  %v3366_v48 = vor.u32 %v3890_v16, %v3365_v15  ;;  %v3402_v51 = vor.u32 %v3897_v47, %v3399_v53  ;;  %v3914_v15 = vld [vmem:[#allocation5 + $0x154] sm:$0xf0]  ;;  %v3314_v19 = vor.u32 %v3875_v7, %v3311_v8  ;;  %v3913_v8 = vld [vmem:[#allocation5 + $0x154] sm:$0xf] }
  0xe0   :  { %2068 = vmatpush.bf16.msrb.mxu1 %v3390_v34  ;;  %v1405_v9 = vpop.f32.mrf.mxu2  ;;  %v3330_v34 = vor.u32 %v3879_v49, %v3327_v50  ;;  %v3429_v50 = vld [vmem:[#allocation5 + $0x110] sm:$0xf] }
  0xe2   :  { %2055 = vmatpush.bf16.msrb.mxu3 %v3326_v58  ;;  %v3478_v58 = vor.u32 %v3918_v60, %v3477_v55 }
  0xe4   :  { %2069 = vmatpush.bf16.msrb.mxu1 %v3382_v3  ;;  %2078 = vmatpush.bf16.msrb.mxu2 %v3478_v58  ;;  %v3383_v3 = vld [vmem:[#allocation5 + $0xb8] sm:$0xf0]  ;;  %v3421_v58 = vld [vmem:[#allocation5 + $0x100] sm:$0xf] }
  0xe6   :  { %2056 = vmatpush.bf16.msrb.mxu3 %v3318_v63  ;;  %v3319_v63 = vld [vmem:[#allocation5 + $0x38] sm:$0xf0] }
  0xe7   :  { %v3322_v4 = vor.u32 %v3877_v62, %v3319_v63  ;;  %v3915_v62 = vld [vmem:[#allocation5 + $0x164] sm:$0xf] }
  0xe8   :  { %2070 = vmatpush.bf16.msrb.mxu1 %v3374_v14  ;;  %2079 = vmatpush.bf16.msrb.mxu2 %v3470_v1  ;;  %v3461_v14 = vld [vmem:[#allocation5 + $0x150] sm:$0xf] }
  0xe9   :  { %v3541_v1 = vld [vmem:[#allocation5 + $0x1f0] sm:$0xf] }
  0xea   :  { %2057 = vmatpush.bf16.msrb.mxu3 %v3310_v10  ;;  %v3386_v10 = vor.u32 %v3893_v2, %v3383_v3  ;;  %v3934_v2 = vld [vmem:[#allocation5 + $0x1f4] sm:$0xf0] }
  0xeb   :  { %v3542_v3 = vor.u32 %v3934_v2, %v3541_v1  ;;  %v3931_v2 = vld [vmem:[#allocation5 + $0x1e4] sm:$0xf] }
  0xec   :  { %2071 = vmatpush.bf16.msrb.mxu1 %v3366_v48  ;;  %v1416_v56 = vpop.f32.mrf.mxu0  ;;  %v1429_v39 = vpop.f32.mrf.mxu1  ;;  %v3303_v48 = vld [vmem:[#allocation5 + $0x18] sm:$0xf0] }
  0xed   :  { %v1417_v27 = vadd.f32 %v1416_v56, %v1404_v57  ;;  %v3306_v9 = vor.u32 %v3873_v21, %v3303_v48  ;;  %2091 = vmatpush.bf16.msrb.mxu0 %v3542_v3  ;;  %v3525_v48 = vld [vmem:[#allocation5 + $0x1d0] sm:$0xf]  ;;  %v3535_v3 = vld [vmem:[#allocation5 + $0x1e8] sm:$0xf0] }
  0xee   :  { %2058 = vmatpush.bf16.msrb.mxu3 %v3302_v17  ;;  %v3462_v17 = vor.u32 %v3914_v15, %v3461_v14 }
  0xef   :  { %v1430_v45 = vadd.f32 %v1429_v39, %v1417_v27  ;;  %v3479_v39 = vld [vmem:[#allocation5 + $0x178] sm:$0xf0]  ;;  %v3928_v27 = vld [vmem:[#allocation5 + $0x1c4] sm:$0xf0] }
  0xf0   :  { %2072 = vmatpush.bf16.msrb.mxu1 %v3358_v32  ;;  %2080 = vmatpush.bf16.msrb.mxu2 %v3462_v17  ;;  %v3370_v32 = vor.u32 %v3889_v23, %v3367_v24  ;;  %v3482_v63 = vor.u32 %v3917_v61, %v3479_v39  ;;  %v3911_v17 = vld [vmem:[#allocation5 + $0x144] sm:$0xf]  ;;  %v3909_v23 = vld [vmem:[#allocation5 + $0x134] sm:$0xf]  ;;  %v3447_v24 = vld [vmem:[#allocation5 + $0x138] sm:$0xf0] }
  0xf1   :  { %v3933_v39 = vld [vmem:[#allocation5 + $0x1f4] sm:$0xf] }
  0xf2   :  { %2059 = vmatpush.bf16.msrb.mxu3 %v3294_v28  ;;  %v3454_v28 = vor.u32 %v3912_v26, %v3453_v25  ;;  %v3450_v25 = vor.u32 %v3909_v23, %v3447_v24  ;;  %v3517_v26 = vld [vmem:[#allocation5 + $0x1c0] sm:$0xf]  ;;  %v3923_v24 = vld [vmem:[#allocation5 + $0x1a4] sm:$0xf] }
  0xf4   :  { %2117 = vmatpush.bf16.msra.mxu1 %v3418_v37  ;;  %v1442_v12 = vpop.f32.mrf.mxu3  ;;  %v1418_v16 = vpop.f32.mrf.mxu0  ;;  %2081 = vmatpush.bf16.msrb.mxu2 %v3454_v28  ;;  %v3907_v28 = vld [vmem:[#allocation5 + $0x124] sm:$0xf] }
  0xf5   :  { %2060 = vmatmul.bf16.vlgmr.msrb.gmra.mxu3 %v4208_v42  ;;  %v1431_v35 = vpop.f32.mrf.mxu1  ;;  %v1443_v53 = vadd.f32 %v1442_v12, %v1430_v45  ;;  %v3533_v12 = vld [vmem:[#allocation5 + $0x1e0] sm:$0xf] }
  0xf6   :  { %2104 = vmatpush.bf16.msra.mxu3 %v3354_v31  ;;  %v3295_v31 = vld [vmem:[#allocation5 + $0x8] sm:$0xf0]  ;;  %v3534_v14 = vor.u32 %v3932_v13, %v3533_v12  ;;  %v3930_v35 = vld [vmem:[#allocation5 + $0x1d4] sm:$0xf0]  ;;  %v3501_v45 = vld [vmem:[#allocation5 + $0x1a0] sm:$0xf] }
  0xf7   :  { %v3527_v12 = vld [vmem:[#allocation5 + $0x1d8] sm:$0xf0] }
  0xf8   :  { %2118 = vmatpush.bf16.msra.mxu1 %v3410_v46  ;;  %v1455_v18 = vpop.f32.mrf.mxu2  ;;  %v3298_v46 = vor.u32 %v3871_v30, %v3295_v31  ;;  %2082 = vmatpush.bf16.msrb.mxu2 %v3446_v40  ;;  %v3439_v30 = vld [vmem:[#allocation5 + $0x128] sm:$0xf0]  ;;  %v3509_v31 = vld [vmem:[#allocation5 + $0x1b0] sm:$0xf]  ;;  %v3431_v40 = vld [vmem:[#allocation5 + $0x118] sm:$0xf0] }
  0xf9   :  { %v1456_v52 = vadd.f32 %v1455_v18, %v1443_v53  ;;  %2092 = vmatpush.bf16.msrb.mxu0 %v3534_v14  ;;  %v3455_v18 = vld [vmem:[#allocation5 + $0x148] sm:$0xf0]  ;;  %v3442_v36 = vor.u32 %v3907_v28, %v3439_v30  ;;  %v3495_v28 = vld [vmem:[#allocation5 + $0x198] sm:$0xf0] }
  0xfa   :  { %2105 = vmatpush.bf16.msra.mxu3 %v3346_v43  ;;  %v3437_v43 = vld [vmem:[#allocation5 + $0x120] sm:$0xf]  ;;  %v3458_v21 = vor.u32 %v3911_v17, %v3455_v18  ;;  %v3927_v17 = vld [vmem:[#allocation5 + $0x1c4] sm:$0xf]  ;;  %v3519_v18 = vld [vmem:[#allocation5 + $0x1c8] sm:$0xf0] }
  0xfb   :  { %v3438_v49 = vor.u32 %v3908_v44, %v3437_v43  ;;  %v276_v43 = vperm.slane %v4191_v6, 2 }
  0xfc   :  { %2119 = vmatpush.bf16.msra.mxu1 %v3402_v51  ;;  %v1444_v37 = vpop.f32.mrf.mxu3  ;;  %v3906_v51 = vld [vmem:[#allocation5 + $0x114] sm:$0xf0] }
  0xfd   :  { %2083 = vmatpush.bf16.msrb.mxu2 %v3438_v49  ;;  %v3430_v54 = vor.u32 %v3906_v51, %v3429_v50  ;;  %v3903_v50 = vld [vmem:[#allocation5 + $0x104] sm:$0xf]  ;;  %v3423_v51 = vld [vmem:[#allocation5 + $0x108] sm:$0xf0] }
  0xfe   :  { %2106 = vmatpush.bf16.msra.mxu3 %v3338_v20  ;;  %v3362_v20 = vor.u32 %v3887_v33, %v3359_v38  ;;  %v3905_v38 = vld [vmem:[#allocation5 + $0x114] sm:$0xf] }
 0x100   :  { %2120 = vmatpush.bf16.msra.mxu1 %v3394_v0  ;;  %v1457_v47 = vpop.f32.mrf.mxu2  ;;  %v3471_v0 = vld [vmem:[#allocation5 + $0x168] sm:$0xf0] }
 0x101   :  { %2084 = vmatpush.bf16.msrb.mxu2 %v3430_v54  ;;  %v3434_v47 = vor.u32 %v3905_v38, %v3431_v40  ;;  %v3426_v54 = vor.u32 %v3903_v50, %v3423_v51 }
 0x102   :  { %2107 = vmatpush.bf16.msra.mxu3 %v3330_v34  ;;  %v3422_v34 = vor.u32 %v3904_v29, %v3421_v58 }
 0x104   :  { %2121 = vmatpush.bf16.msra.mxu1 %v3386_v10  ;;  %v1468_v55 = vpop.f32.mrf.mxu3  ;;  %v3463_v10 = vld [vmem:[#allocation5 + $0x158] sm:$0xf0] }
 0x105   :  { %v1469_v60 = vadd.f32 %v1468_v55, %v1456_v52  ;;  %2085 = vmatpush.bf16.msrb.mxu2 %v3422_v34  ;;  %v3466_v41 = vor.u32 %v3913_v8, %v3463_v10  ;;  %v3493_v55 = vld [vmem:[#allocation5 + $0x190] sm:$0xf]  ;;  %v3920_v34 = vld [vmem:[#allocation5 + $0x184] sm:$0xf0] }
 0x106   :  { %2108 = vmatpush.bf16.msra.mxu3 %v3322_v4 }
 0x107   :  { %v1655_v56 = vmax.f32 %v1469_v60, 0.0  ;;  %v3922_v60 = vld [vmem:[#allocation5 + $0x194] sm:$0xf0] }
 0x108   :  { %2122 = vmatpush.bf16.msra.mxu1 %v3378_v22  ;;  %v3526_v22 = vor.u32 %v3930_v35, %v3525_v48  ;;  %v3925_v35 = vld [vmem:[#allocation5 + $0x1b4] sm:$0xf] }
 0x109   :  { %v1659_v59 = vpack.c.bf16 %v1655_v56, %v1655_v56  ;;  %2130 = vmatpush.bf16.msra.mxu2 %v3482_v63  ;;  %v3494_v56 = vor.u32 %v3922_v60, %v3493_v55 }
 0x10a   :  { %2109 = vmatpush.bf16.msra.mxu3 %v3314_v19  ;;  %2093 = vmatpush.bf16.msrb.mxu0 %v3526_v22  ;;  %v3511_v22 = vld [vmem:[#allocation5 + $0x1b8] sm:$0xf0] }
 0x10b   :  { %2073 = vmatmul.bf16.vlgmr.msrb.gmra.mxu1 %v1659_v59  ;;  %v3514_v23 = vor.u32 %v3925_v35, %v3511_v22  ;;  %v3943_v35 = vld [vmem:[%s4336_s5 + $0x40] sm:$0xff] }
 0x10c   :  { %2123 = vmatpush.bf16.msra.mxu1 %v3370_v32  ;;  %v1470_v4 = vpop.f32.mrf.mxu3  ;;  %v4215_v5 = vpop.f32.mrf.mxu0  ;;  %v3926_v32 = vld [vmem:[#allocation5 + $0x1b4] sm:$0xf0] }
 0x10d   :  { %v1481_v7 = vpop.f32.mrf.mxu1  ;;  %v3510_v37 = vor.u32 %v3926_v32, %v3509_v31  ;;  %v3919_v31 = vld [vmem:[#allocation5 + $0x184] sm:$0xf]  ;;  %v3487_v32 = vld [vmem:[#allocation5 + $0x188] sm:$0xf0] }
 0x10e   :  { %2110 = vmatpush.bf16.msra.mxu3 %v3306_v9  ;;  %v3518_v9 = vor.u32 %v3928_v27, %v3517_v26  ;;  %v3921_v27 = vld [vmem:[#allocation5 + $0x194] sm:$0xf] }
 0x10f   :  { %v3498_v30 = vor.u32 %v3921_v27, %v3495_v28 }
 0x110   :  { %2124 = vmatpush.bf16.msra.mxu1 %v3362_v20  ;;  %2094 = vmatpush.bf16.msrb.mxu0 %v3518_v9  ;;  %v1482_v20 = vadd.f32 %v1481_v7, %v276_v43  ;;  %v3538_v7 = vor.u32 %v3931_v2, %v3535_v3  ;;  %v277_v9 = vperm.slane %v4191_v6, 3 }
 0x112   :  { %2111 = vmatpush.bf16.msra.mxu3 %v3298_v46  ;;  %v3924_v46 = vld [vmem:[#allocation5 + $0x1a4] sm:$0xf0] }
 0x113   :  { %v3502_v53 = vor.u32 %v3924_v46, %v3501_v45 }
 0x114   :  { %v1509_v16 = vpop.f32.mrf.mxu0  ;;  %2095 = vmatpush.bf16.msrb.mxu0 %v3510_v37 }
 0x115   :  { %2112 = vmatmul.bf16.vlgmr.msra.gmra.mxu3 %v4208_v42  ;;  %v3474_v42 = vor.u32 %v3915_v62, %v3471_v0  ;;  %v1483_v57 = vpop.f32.mrf.mxu1  ;;  %v3543_v62 = vld [vmem:[#allocation5 + $0x1f8] sm:$0xf0] }
 0x116   :  { %v3546_v63 = vor.u32 %v3933_v39, %v3543_v62  ;;  %v3522_v57 = vor.u32 %v3927_v17, %v3519_v18  ;;  %v3947_v17 = vld [vmem:[%s4336_s5 + $0x60] sm:$0xff] }
 0x117   :  { %2131 = vmatpush.bf16.msra.mxu2 %v3474_v42 }
 0x118   :  { %v1494_v15 = vpop.f32.mrf.mxu3  ;;  %v1520_v19 = vpop.f32.mrf.mxu2  ;;  %2096 = vmatpush.bf16.msrb.mxu0 %v3502_v53 }
 0x119   :  { %v1495_v52 = vadd.f32 %v1494_v15, %v1482_v20 }
 0x11b   :  { %2132 = vmatpush.bf16.msra.mxu2 %v3466_v41  ;;  %2125 = vmatmul.bf16.vlgmr.msra.gmra.mxu1 %v1659_v59  ;;  %v1508_v29 = vadd.f32 %v4215_v5, %v1495_v52  ;;  %v3485_v59 = vld [vmem:[#allocation5 + $0x180] sm:$0xf]  ;;  %v3929_v5 = vld [vmem:[#allocation5 + $0x1d4] sm:$0xf] }
 0x11c   :  { %v1559_v11 = vpop.f32.mrf.mxu0  ;;  %2097 = vmatpush.bf16.msrb.mxu0 %v3494_v56  ;;  %v3486_v61 = vor.u32 %v3920_v34, %v3485_v59  ;;  %v3530_v14 = vor.u32 %v3929_v5, %v3527_v12  ;;  %v3950_v5 = vld [vmem:[%s4336_s5 + $0x78] sm:$0xff]  ;;  %v3937_v12 = vld [vmem:[%s4336_s5 + $0x10] sm:$0xff] }
 0x11d   :  { %v1521_v0 = vadd.f32 %v1520_v19, %v1508_v29  ;;  %2305 = vmatpush.bf16.msrb.mxu1 %v3950_v5 }
 0x11f   :  { %2133 = vmatpush.bf16.msra.mxu2 %v3458_v21 }
 0x120   :  { %v1496_v33 = vpop.f32.mrf.mxu3  ;;  %v1522_v44 = vpop.f32.mrf.mxu2  ;;  %2098 = vmatpush.bf16.msrb.mxu0 %v3486_v61 }
 0x123   :  { %2134 = vmatpush.bf16.msra.mxu2 %v3450_v25  ;;  %v3503_v25 = vld [vmem:[#allocation5 + $0x1a8] sm:$0xf0] }
 0x124   :  { %v1561_v49 = vpop.f32.mrf.mxu0  ;;  %2143 = vmatpush.bf16.msra.mxu0 %v3546_v63  ;;  %v3506_v26 = vor.u32 %v3923_v24, %v3503_v25  ;;  %v3957_v24 = vld [vmem:[%s4338_s7 + $0x30] sm:$0xff] }
 0x127   :  { %2135 = vmatpush.bf16.msra.mxu2 %v3442_v36  ;;  %v3490_v36 = vor.u32 %v3919_v31, %v3487_v32 }
 0x128   :  { %2144 = vmatpush.bf16.msra.mxu0 %v3538_v7  ;;  %v3941_v7 = vld [vmem:[%s4336_s5 + $0x30] sm:$0xff] }
 0x12b   :  { %2136 = vmatpush.bf16.msra.mxu2 %v3434_v47 }
 0x12c   :  { %v1533_v58 = vpop.f32.mrf.mxu1  ;;  %2145 = vmatpush.bf16.msra.mxu0 %v3530_v14  ;;  %v3936_v14 = vld [vmem:[%s4336_s5 + $0x8] sm:$0xff] }
 0x12d   :  { %v1534_v4 = vadd.f32 %v1533_v58, %v1521_v0  ;;  %v1726_v58 = vld [vmem:[%s4335_s4] sm:$0x3] }
 0x12e   :  { %v1728_v29 = vperm.slane %v1726_v58, 0  ;;  %v1729_v0 = vperm.slane %v1726_v58, 1 }
 0x12f   :  { %2137 = vmatpush.bf16.msra.mxu2 %v3426_v54 }
 0x130   :  { %v1585_v1 = vpop.f32.mrf.mxu0  ;;  %2146 = vmatpush.bf16.msra.mxu0 %v3522_v57  ;;  %v3945_v57 = vld [vmem:[%s4336_s5 + $0x50] sm:$0xff] }
 0x134   :  { %v1535_v42 = vpop.f32.mrf.mxu1  ;;  %2147 = vmatpush.bf16.msra.mxu0 %v3514_v23  ;;  %v3958_v23 = vld [vmem:[%s4338_s7 + $0x38] sm:$0xff] }
 0x138   :  { %v1546_v8 = vpop.f32.mrf.mxu3  ;;  %v1572_v41 = vpop.f32.mrf.mxu2  ;;  %2148 = vmatpush.bf16.msra.mxu0 %v3506_v26  ;;  %v3956_v26 = vld [vmem:[%s4338_s7 + $0x28] sm:$0xff] }
 0x139   :  { %v1547_v10 = vadd.f32 %v1546_v8, %v1534_v4  ;;  %v1587_v16 = vpop.f32.mrf.mxu0  ;;  %v1573_v33 = vadd.f32 %v1572_v41, %v277_v9  ;;  %v3942_v4 = vld [vmem:[%s4336_s5 + $0x38] sm:$0xff]  ;;  %v3940_v8 = vld [vmem:[%s4336_s5 + $0x28] sm:$0xff] }
 0x13a   :  { %2292 = vmatpush.bf16.msrb.mxu3 %v3942_v4  ;;  %v3938_v41 = vld [vmem:[%s4336_s5 + $0x18] sm:$0xff]  ;;  %v3935_v16 = vld [vmem:[%s4336_s5] sm:$0xff] }
 0x13b   :  { %v1560_v13 = vadd.f32 %v1559_v11, %v1547_v10  ;;  %v1586_v37 = vadd.f32 %v1585_v1, %v1573_v33  ;;  %v3939_v10 = vld [vmem:[%s4336_s5 + $0x20] sm:$0xff] }
 0x13c   :  { %2149 = vmatpush.bf16.msra.mxu0 %v3498_v30  ;;  %v3955_v30 = vld [vmem:[%s4338_s7 + $0x20] sm:$0xff] }
 0x13d   :  { %v1656_v15 = vmax.f32 %v1560_v13, 0.0  ;;  %v3949_v13 = vld [vmem:[%s4336_s5 + $0x70] sm:$0xff]  ;;  %v3976_v4 = vld [vmem:[%s4341_s10] ss:$0 sm:$0xff] }
 0x13e   :  { %2293 = vmatpush.bf16.msrb.mxu3 %v3941_v7  ;;  %2306 = vmatpush.bf16.msrb.mxu1 %v3949_v13 }
 0x13f   :  { %v1660_v19 = vpack.c.bf16 %v1656_v15, %v1656_v15  ;;  %v3948_v15 = vld [vmem:[%s4336_s5 + $0x68] sm:$0xff] }
 0x140   :  { %v1548_v21 = vpop.f32.mrf.mxu3  ;;  %v1574_v48 = vpop.f32.mrf.mxu2  ;;  %2150 = vmatpush.bf16.msra.mxu0 %v3490_v36 }
 0x141   :  { %2086 = vmatmul.bf16.vlgmr.msrb.gmra.mxu2 %v1660_v19  ;;  %v3944_v48 = vld [vmem:[%s4336_s5 + $0x48] sm:$0xff] }
 0x142   :  { %2294 = vmatpush.bf16.msrb.mxu3 %v3940_v8  ;;  %2307 = vmatpush.bf16.msrb.mxu1 %v3948_v15 }
 0x143   :  { %2388 = vmatpush.bf16.msrb.mxu2 %v3958_v23 }
 0x146   :  { %2295 = vmatpush.bf16.msrb.mxu3 %v3939_v10  ;;  %2308 = vmatpush.bf16.msrb.mxu1 %v3947_v17 }
 0x147   :  { %2389 = vmatpush.bf16.msrb.mxu2 %v3957_v24 }
 0x14a   :  { %2296 = vmatpush.bf16.msrb.mxu3 %v3938_v41 }
 0x14b   :  { %2390 = vmatpush.bf16.msrb.mxu2 %v3956_v26 }
 0x14c   :  { %v1598_v11 = vpop.f32.mrf.mxu1 }
 0x14d   :  { %v1599_v40 = vadd.f32 %v1598_v11, %v1586_v37 }
 0x14e   :  { %2297 = vmatpush.bf16.msrb.mxu3 %v3937_v12 }
 0x14f   :  { %2391 = vmatpush.bf16.msrb.mxu2 %v3955_v30 }
 0x150   :  { %v1637_v38 = vpop.f32.mrf.mxu0 }
 0x151   :  { %2138 = vmatmul.bf16.vlgmr.msra.gmra.mxu2 %v1660_v19  ;;  %v3946_v19 = vld [vmem:[%s4336_s5 + $0x58] sm:$0xff] }
 0x152   :  { %2298 = vmatpush.bf16.msrb.mxu3 %v3936_v14  ;;  %2309 = vmatpush.bf16.msrb.mxu1 %v3946_v19 }
 0x154   :  { %v1600_v43 = vpop.f32.mrf.mxu1 }
 0x156   :  { %2299 = vmatpush.bf16.msrb.mxu3 %v3935_v16  ;;  %2310 = vmatpush.bf16.msrb.mxu1 %v3945_v57 }
 0x158   :  { %v1611_v44 = vpop.f32.mrf.mxu3  ;;  %v1624_v46 = vpop.f32.mrf.mxu2 }
 0x159   :  { %v1612_v45 = vadd.f32 %v1611_v44, %v1599_v40  ;;  %v1639_v53 = vpop.f32.mrf.mxu0  ;;  %v3954_v44 = vld [vmem:[%s4338_s7 + $0x18] sm:$0xff] }
 0x15a   :  { %2311 = vmatpush.bf16.msrb.mxu1 %v3944_v48  ;;  %2392 = vmatpush.bf16.msrb.mxu2 %v3954_v44  ;;  %v3966_v53 = vld [vmem:[%s4340_s9 + $0x38] sm:$0xff] }
 0x15b   :  { %v1625_v47 = vadd.f32 %v1624_v46, %v1612_v45  ;;  %v3953_v45 = vld [vmem:[%s4338_s7 + $0x10] sm:$0xff]  ;;  %v3952_v46 = vld [vmem:[%s4338_s7 + $0x8] sm:$0xff] }
 0x15c   :  { %v1650_v20 = vpop.f32.mrf.mxu1 }
 0x15d   :  { %v1638_v6 = vadd.f32 %v1637_v38, %v1625_v47  ;;  %v3951_v47 = vld [vmem:[%s4338_s7] sm:$0xff] }
 0x15e   :  { %2312 = vmatpush.bf16.msrb.mxu1 %v3943_v35  ;;  %2393 = vmatpush.bf16.msrb.mxu2 %v3953_v45 }
 0x15f   :  { %v1651_v49 = vadd.f32 %v1650_v20, %v1638_v6  ;;  %v3965_v6 = vld [vmem:[%s4340_s9 + $0x30] sm:$0xff]  ;;  %v3964_v20 = vld [vmem:[%s4340_s9 + $0x28] sm:$0xff] }
 0x160   :  { %v1613_v50 = vpop.f32.mrf.mxu3  ;;  %v1626_v51 = vpop.f32.mrf.mxu2 }
 0x161   :  { %v1657_v52 = vmax.f32 %v1651_v49, 0.0  ;;  %v3963_v49 = vld [vmem:[%s4340_s9 + $0x20] sm:$0xff]  ;;  %v3962_v51 = vld [vmem:[%s4340_s9 + $0x18] sm:$0xff] }
 0x162   :  { %2394 = vmatpush.bf16.msrb.mxu2 %v3952_v46 }
 0x163   :  { %v1661_v54 = vpack.c.bf16 %v1657_v52, %v1657_v52  ;;  %v3961_v52 = vld [vmem:[%s4340_s9 + $0x10] sm:$0xff] }
 0x164   :  { %v1652_v55 = vpop.f32.mrf.mxu1 }
 0x165   :  { %2099 = vmatmul.bf16.vlgmr.msrb.gmra.mxu0 %v1661_v54 }
 0x166   :  { %2395 = vmatpush.bf16.msrb.mxu2 %v3951_v47  ;;  %2471 = vmatpush.bf16.msrb.mxu0 %v3966_v53 }
 0x16a   :  { %2472 = vmatpush.bf16.msrb.mxu0 %v3965_v6 }
 0x16e   :  { %2473 = vmatpush.bf16.msrb.mxu0 %v3964_v20 }
 0x172   :  { %2474 = vmatpush.bf16.msrb.mxu0 %v3963_v49 }
 0x175   :  { %2151 = vmatmul.bf16.vlgmr.msra.gmra.mxu0 %v1661_v54  ;;  %v3974_v54 = vld [vmem:[%s4337_s6] ss:$0 sm:$0xff] }
 0x176   :  { %2475 = vmatpush.bf16.msrb.mxu0 %v3962_v51 }
 0x178   :  { %v2061_v60 = vpop.f32.mrf.mxu3 }
 0x179   :  { %v2062_v59 = vadd.f32 %v2061_v60, %v1728_v29 }
 0x17a   :  { %2476 = vmatpush.bf16.msrb.mxu0 %v3961_v52 }
 0x180   :  { %v2063_v56 = vpop.f32.mrf.mxu3 }
 0x188   :  { %v2074_v34 = vpop.f32.mrf.mxu1 }
 0x189   :  { %v2075_v39 = vadd.f32 %v2074_v34, %v2062_v59 }
 0x190   :  { %v2076_v62 = vpop.f32.mrf.mxu1 }
 0x191   :  { %v3975_v62 = vld [vmem:[%s4339_s8] ss:$0 sm:$0xff] }
 0x198   :  { %v2113_v61 = vpop.f32.mrf.mxu3  ;;  %v2126_v2 = vpop.f32.mrf.mxu1 }
 0x199   :  { %v2114_v1 = vadd.f32 %v2113_v61, %v1729_v0  ;;  %v3960_v61 = vld [vmem:[%s4340_s9 + $0x8] sm:$0xff] }
 0x19a   :  { %2477 = vmatpush.bf16.msrb.mxu0 %v3960_v61 }
 0x19b   :  { %v2127_v3 = vadd.f32 %v2126_v2, %v2114_v1 }
 0x1a0   :  { %v2115_v63 = vpop.f32.mrf.mxu3  ;;  %v2128_v42 = vpop.f32.mrf.mxu1 }
 0x1c4   :  { %v2087_v18 = vpop.f32.mrf.mxu2 }
 0x1c5   :  { %v2088_v27 = vadd.f32 %v2087_v18, %v2075_v39  ;;  %v3959_v39 = vld [vmem:[%s4340_s9] sm:$0xff]  ;;  %s2492_s9 = sshll.u32 %s4342_s11, 4  ;;  %s2493_s9 = int_to_ptr.hbm [resolvable:$true] %s2492_s9 }
 0x1c6   :  { %2478 = vmatpush.bf16.msrb.mxu0 %v3959_v39 }
 0x1cc   :  { %v2089_v21 = vpop.f32.mrf.mxu2 }
 0x1d4   :  { %v2139_v22 = vpop.f32.mrf.mxu2 }
 0x1d5   :  { %v2140_v11 = vadd.f32 %v2139_v22, %v2127_v3 }
 0x1dc   :  { %v2141_v25 = vpop.f32.mrf.mxu2 }
 0x1e2   :  { %v2100_v28 = vpop.f32.mrf.mxu0 }
 0x1e3   :  { %v2101_v9 = vadd.f32 %v2100_v28, %v2088_v27 }
 0x1e5   :  { %v2156_v31 = vmax.f32 %v2101_v9, 0.0 }
 0x1e7   :  { %v2158_v32 = vpack.c.bf16 %v2156_v31, %v2156_v31 }
 0x1e9   :  { %2300 = vmatmul.bf16.vlgmr.msrb.gmra.mxu3 %v2158_v32 }
 0x1ea   :  { %v2102_v33 = vpop.f32.mrf.mxu0 }
 0x1f2   :  { %v2152_v36 = vpop.f32.mrf.mxu0 }
 0x1f3   :  { %v2153_v37 = vadd.f32 %v2152_v36, %v2140_v11 }
 0x1f5   :  { %v2157_v38 = vmax.f32 %v2153_v37, 0.0 }
 0x1f7   :  { %v2159_v40 = vpack.c.bf16 %v2157_v38, %v2157_v38 }
 0x1f9   :  { %2313 = vmatmul.bf16.vlgmr.msrb.gmra.mxu1 %v2159_v40 }
 0x1fa   :  { %v2154_v43 = vpop.f32.mrf.mxu0 }
 0x26c   :  { %v2301_v50 = vpop.f32.mrf.mxu3 }
 0x26d   :  { %v2302_v60 = vadd.f32 %v3974_v54, %v2301_v50 }
 0x274   :  { %v2303_v55 = vpop.f32.mrf.mxu3 }
 0x276   :  { %v2314_v56 = vpop.f32.mrf.mxu1 }
 0x277   :  { %v2315_v58 = vadd.f32 %v2314_v56, %v2302_v60 }
 0x279   :  { %v2318_v29 = vmax.f32 %v2315_v58, 0.0 }
 0x27b   :  { %v2319_v59 = vpack.c.bf16 %v2318_v29, %v2318_v29 }
 0x27d   :  { %2396 = vmatmul.bf16.vlgmr.msrb.gmra.mxu2 %v2319_v59 }
 0x27e   :  { %v2316_v34 = vpop.f32.mrf.mxu1 }
 0x300   :  { %v2397_v63 = vpop.f32.mrf.mxu2 }
 0x301   :  { %v2398_v0 = vadd.f32 %v3975_v62, %v2397_v63 }
 0x303   :  { %v2401_v1 = vmax.f32 %v2398_v0, 0.0 }
 0x305   :  { %v2402_v2 = vpack.c.bf16 %v2401_v1, %v2401_v1 }
 0x307   :  { %2479 = vmatmul.bf16.vlgmr.msrb.gmra.mxu0 %v2402_v2 }
 0x308   :  { %v2399_v3 = vpop.f32.mrf.mxu2 }
 0x384   :  { %v2480_v42 = vpop.f32.mrf.mxu0 }
 0x385   :  { %v2481_v7 = vadd.f32 %v3976_v4, %v2480_v42 }
 0x387   :  { %2484 = vst [vmem:[#allocation7] sm:$0xff] %v2481_v7 }
 0x388   :  { %2495 = dma.vmem_to_hbm [thread:$0]  %s2491_s17, 128, %s2493_s9, [#allocation4]  }
 0x38c   :  { %v2482_v8 = vpop.f32.mrf.mxu0 }
 0x38d   :  { %4053 = dma.done.wait [#allocation4], 128  }
 0x38e   :  { %4054 = vsyncadd [#allocation4], 4294967168 }
 0x38f   :  { %2500 = vsyncpa [#allocation3], 1 }
 0x390   :  { %2501 = vsyncpa [#allocation6], 1 }
 0x391   :  { %2502 = vsyncpa [#allocation4], 1 }

</bundles_post_ra>
